<compile_context>
chip_gen: v7x
topology: tpu7x:2x2x1
jax: 0.10.0
libtpu: 0.0.40
codegen_flags: <defaults>
</compile_context>

<pallas_src>
import jax
import jax.numpy as jnp
import numpy as np
from jax.experimental import pallas as pl
from jax.experimental.pallas import tpu as pltpu


def _round_up(v, m):
    return ((v + m - 1) // m) * m


def lstm_tagger_kernel(x_ref, len_ref, wih_ref, whh_ref, b_ref,
                       wfc_ref, bfc_ref, out_ref, xg_sc, hout_sc):
    # x_ref:   (T, TB, D)   f32   time-major input tile (batch tile TB)
    # len_ref: (TB, 1)      i32   per-sequence lengths
    # wih_ref: (D, Gp)      bf16  W_ih^T, gate k at cols [k*H, (k+1)*H)
    # whh_ref: (H, Gp)      bf16  W_hh^T, same natural gate packing
    # b_ref:   (1, Gp)      f32   b_ih + b_hh (zero in padded cols)
    # wfc_ref: (H, Sp)      bf16  W_fc^T (zero-padded tag cols)
    # bfc_ref: (1, Sp)      f32   fc bias, -1e30 in padded tag lanes
    # out_ref: (T, TB, Sp)  f32   log_softmax scores
    # xg_sc:   (T*TB, Gp)   f32   VMEM scratch: x @ W_ih + b (hoisted)
    # hout_sc: (T*TB, H)    f32   VMEM scratch: LSTM outputs
    T_steps, TB, _ = x_ref.shape
    H, _ = whh_ref.shape
    Sp = wfc_ref.shape[1]

    # ---- hoisted input projection: one big MXU matmul (M = T*TB rows) ----
    x_flat = x_ref[...].reshape(T_steps * TB, x_ref.shape[2]).astype(jnp.bfloat16)
    xg_sc[...] = (jnp.dot(x_flat, wih_ref[...],
                          preferred_element_type=jnp.float32)
                  + b_ref[...])

    # Lane-broadcast the lengths ONCE (not per unrolled step).
    lens_b = jnp.broadcast_to(len_ref[...], (TB, H))        # (TB, H) int32

    def step(t, carry):
        h, c = carry                                        # (TB, H) f32 each
        row = pl.multiple_of(t * TB, TB)

        # Only the recurrent matmul sits on the serial critical path; W_hh is
        # read from its ref (bf16, tiny) inside the dot.
        gates = (jnp.dot(h.astype(jnp.bfloat16), whh_ref[...],
                         preferred_element_type=jnp.float32)
                 + xg_sc[pl.ds(row, TB), :])                # (TB, Gp)

        # PyTorch LSTM gate order: i, f, g, o — natural packing at k*H.
        i_g = jax.nn.sigmoid(gates[:, 0 * H:1 * H])
        f_g = jax.nn.sigmoid(gates[:, 1 * H:2 * H])
        g_g = jnp.tanh(gates[:, 2 * H:3 * H])
        o_g = jax.nn.sigmoid(gates[:, 3 * H:4 * H])

        c_new = f_g * c + i_g * g_g
        h_new = o_g * jnp.tanh(c_new)

        # pack_padded_sequence: the recurrence only advances while t < length.
        valid = lens_b > t                                  # (TB, H) bool
        h = jnp.where(valid, h_new, h)
        c = jnp.where(valid, c_new, c)

        # pad_packed_sequence pads invalid steps with 0 before the Linear layer.
        hout_sc[pl.ds(row, TB), :] = jnp.where(valid, h_new, 0.0)
        return h, c

    h0 = jnp.zeros((TB, H), jnp.float32)
    jax.lax.fori_loop(0, T_steps, step, (h0, h0), unroll=min(T_steps, 8))

    # ---- fc + log_softmax epilogue: one batched matmul, outside the loop ----
    logits = (jnp.dot(hout_sc[...].astype(jnp.bfloat16), wfc_ref[...],
                      preferred_element_type=jnp.float32)
              + bfc_ref[...])                               # (T*TB, Sp)
    m = jnp.max(logits, axis=-1, keepdims=True)             # padded lanes -1e30
    lse = jnp.log(jnp.sum(jnp.exp(logits - m), axis=-1, keepdims=True)) + m
    scores = logits - lse
    # Single bulk lane-dense store: (TB, Sp) = (8, 128) is exactly one f32 tile.
    out_ref[...] = scores.reshape(T_steps, TB, Sp)


def _pad_params(params, Gp, Sp):
    """Natural gate packing + bf16 matmul operands (biases stay f32)."""
    w_ih_t = params["w_ih_t"].astype(jnp.float32)           # (D, 4H)
    w_hh_t = params["w_hh_t"].astype(jnp.float32)           # (H, 4H)
    b = params["b"].astype(jnp.float32)                     # (1, 4H)
    w_fc_t = params["w_fc_t"].astype(jnp.float32)           # (H, S)
    b_fc = params["b_fc"].astype(jnp.float32)               # (1, S)

    D, G = w_ih_t.shape
    H = w_hh_t.shape[0]
    S = w_fc_t.shape[1]

    wih_p = jnp.zeros((D, Gp), jnp.float32).at[:, :G].set(w_ih_t).astype(jnp.bfloat16)
    whh_p = jnp.zeros((H, Gp), jnp.float32).at[:, :G].set(w_hh_t).astype(jnp.bfloat16)
    b_p = jnp.zeros((1, Gp), jnp.float32).at[:, :G].set(b)
    wfc_p = jnp.zeros((H, Sp), jnp.float32).at[:, :S].set(w_fc_t).astype(jnp.bfloat16)
    # Padded tag lanes get a very negative bias (f32!) so they vanish from the
    # log-sum-exp normalizer.
    bfc_p = jnp.full((1, Sp), -1e30, jnp.float32).at[:, :S].set(b_fc)
    return wih_p, whh_p, b_p, wfc_p, bfc_p


def lstm_predictor_forward(x, lengths, params, *, batch_tile=8):
    """x: [B, T, D] float32 (batch_first), lengths: python list of ints."""
    B, T, D = x.shape
    H = params["w_hh_t"].shape[0]
    S = params["w_fc_t"].shape[1]
    t_out = int(max(lengths))                    # pad_packed_sequence truncates

    Gp = _round_up(4 * H, 128)                   # gate block, 128-lane aligned
    Sp = _round_up(S, 128)                       # lane-dense output
    TB = batch_tile
    Bp = _round_up(B, TB)

    wih_p, whh_p, b_p, wfc_p, bfc_p = _pad_params(params, Gp, Sp)

    # Pad batch, truncate to t_out, go time-major.
    x_p = jnp.zeros((Bp, t_out, D), jnp.float32).at[:B].set(
        x[:, :t_out].astype(jnp.float32))
    x_tm = jnp.transpose(x_p, (1, 0, 2))                                 # (T, Bp, D)
    len_arr = jnp.zeros((Bp, 1), jnp.int32).at[:B, 0].set(
        jnp.asarray(lengths, dtype=jnp.int32))

    # Explicit VMEM budget (v7x: 64 MiB physical / 32 MiB scoped default,
    # v5e: 16 MiB scoped default).
    est = (2 * t_out * TB * D * 4                 # x block (double-buffered)
           + 2 * t_out * TB * Sp * 4              # out block
           + 2 * (D * Gp + H * Gp + H * Sp) * 2   # bf16 weights
           + 2 * (Gp + Sp) * 4 + 2 * TB * 4       # biases + lengths
           + t_out * TB * (Gp + H) * 4)           # xg + h_out scratches
    vmem_limit = int(min(max(2 * est, 16 * 1024 * 1024), 48 * 1024 * 1024))

    grid_spec = pltpu.PrefetchScalarGridSpec(
        num_scalar_prefetch=0,
        grid=(Bp // TB,),                                                # batch tiles
        in_specs=[
            pl.BlockSpec((t_out, TB, D), lambda i: (0, i, 0)),   # x (whole T in VMEM)
            pl.BlockSpec((TB, 1), lambda i: (i, 0)),             # lengths
            pl.BlockSpec((D, Gp), lambda i: (0, 0)),             # W_ih^T (bf16)
            pl.BlockSpec((H, Gp), lambda i: (0, 0)),             # W_hh^T (bf16)
            pl.BlockSpec((1, Gp), lambda i: (0, 0)),             # b_ih + b_hh (f32)
            pl.BlockSpec((H, Sp), lambda i: (0, 0)),             # W_fc^T (bf16)
            pl.BlockSpec((1, Sp), lambda i: (0, 0)),             # fc bias (f32)
        ],
        out_specs=pl.BlockSpec((t_out, TB, Sp), lambda i: (0, i, 0)),
        scratch_shapes=[
            pltpu.VMEM((t_out * TB, Gp), jnp.float32),           # xg = x@W_ih + b
            pltpu.VMEM((t_out * TB, H), jnp.float32),            # LSTM outputs
        ],
    )

    out_tm = pl.pallas_call(
        lstm_tagger_kernel,
        out_shape=jax.ShapeDtypeStruct((t_out, Bp, Sp), jnp.float32),
        grid_spec=grid_spec,
        compiler_params=pltpu.CompilerParams(
            dimension_semantics=("parallel",),     # batch tiles are independent
            vmem_limit_bytes=vmem_limit),
    )(x_tm, len_arr, wih_p, whh_p, b_p, wfc_p, bfc_p)

    # (T, Bp, Sp) -> (B, T_out, S): drop padded batch rows and padded tag lanes.
    return jnp.transpose(out_tm, (1, 0, 2))[:B, :, :S]


def reference_forward(x, lengths, params):
    """Pure-JAX f32 reference mirroring the PyTorch forward."""
    B, T, D = x.shape
    H = params["w_hh_t"].shape[0]
    t_out = int(max(lengths))
    len_arr = jnp.asarray(lengths, dtype=jnp.int32)

    def step(carry, inp):
        h, c = carry
        x_t, t = inp
        gates = x_t @ params["w_ih_t"] + h @ params["w_hh_t"] + params["b"][0]
        i = jax.nn.sigmoid(gates[:, 0:H])
        f = jax.nn.sigmoid(gates[:, H:2 * H])
        g = jnp.tanh(gates[:, 2 * H:3 * H])
        o = jax.nn.sigmoid(gates[:, 3 * H:4 * H])
        c_new = f * c + i * g
        h_new = o * jnp.tanh(c_new)
        valid = (len_arr > t)[:, None]
        return ((jnp.where(valid, h_new, h), jnp.where(valid, c_new, c)),
                jnp.where(valid, h_new, 0.0))

    h0 = jnp.zeros((B, H), jnp.float32)
    c0 = jnp.zeros((B, H), jnp.float32)
    xs = (jnp.transpose(x, (1, 0, 2))[:t_out], jnp.arange(t_out))
    _, outs = jax.lax.scan(step, (h0, c0), xs)              # [T_out, B, H]
    logits = outs @ params["w_fc_t"] + params["b_fc"][0]
    return jnp.transpose(jax.nn.log_softmax(logits, axis=-1), (1, 0, 2))


if __name__ == "__main__":
    # Small shapes consistent with the module: input_dim=32, hidden_dim=32,
    # tagset_size=2, batch=2, seq=8.
    B, T, D, H, S = 2, 8, 32, 32, 2

    key = jax.random.PRNGKey(0)
    ks = jax.random.split(key, 8)
    k = 1.0 / np.sqrt(H)        # PyTorch-style uniform(-1/sqrt(H), 1/sqrt(H))
    params = {
        "w_ih_t": jax.random.uniform(ks[0], (D, 4 * H), jnp.float32, -k, k),
        "w_hh_t": jax.random.uniform(ks[1], (H, 4 * H), jnp.float32, -k, k),
        "b": (jax.random.uniform(ks[2], (1, 4 * H), jnp.float32, -k, k)
              + jax.random.uniform(ks[3], (1, 4 * H), jnp.float32, -k, k)),
        "w_fc_t": jax.random.uniform(ks[4], (H, S), jnp.float32, -k, k),
        "b_fc": jax.random.uniform(ks[5], (1, S), jnp.float32, -k, k),
    }

    x = jax.random.normal(ks[6], (B, T, D), jnp.float32)
    lengths = [8, 5]            # ragged lengths exercise the packing semantics

    out = jax.block_until_ready(lstm_predictor_forward(x, lengths, params))
    ref = jax.block_until_ready(reference_forward(x, lengths, params))

    # bf16 matmul operands (f32 accumulation / carries) -> relaxed tolerance
    # vs the pure-f32 reference.
    np.testing.assert_allclose(np.asarray(out), np.asarray(ref),
                               rtol=5e-2, atol=5e-2)
    print("KERNEL_OK")
</pallas_src>

<mosaic_0001>
module attributes {stable_mosaic.version = 11 : i64} {
  func.func @lstm_tagger_kernel(%arg0: i32, %arg1: memref<8x8x32xf32, #tpu.memory_space<vmem>>, %arg2: memref<8x1xi32, #tpu.memory_space<vmem>>, %arg3: memref<32x128xbf16, #tpu.memory_space<vmem>>, %arg4: memref<32x128xbf16, #tpu.memory_space<vmem>>, %arg5: memref<1x128xf32, #tpu.memory_space<vmem>>, %arg6: memref<32x128xbf16, #tpu.memory_space<vmem>>, %arg7: memref<1x128xf32, #tpu.memory_space<vmem>>, %arg8: memref<8x8x128xf32, #tpu.memory_space<vmem>>, %arg9: memref<64x128xf32, #tpu.memory_space<vmem>>, %arg10: memref<64x32xf32, #tpu.memory_space<vmem>>) attributes {dimension_semantics = [#tpu.dimension_semantics<parallel>], iteration_bounds = array<i64: 1>, scalar_prefetch = 0 : i64, scratch_operands = 2 : i64, tpu.core_type = #tpu.core_type<tc>, window_params = [{transform_indices = @transform_0, window_bounds = array<i64: 8, 8, 32>}, {transform_indices = @transform_1, window_bounds = array<i64: 8, 1>}, {pipeline_mode = #tpu.pipeline_mode<synchronous>, transform_indices = @transform_2, window_bounds = array<i64: 32, 128>}, {pipeline_mode = #tpu.pipeline_mode<synchronous>, transform_indices = @transform_3, window_bounds = array<i64: 32, 128>}, {pipeline_mode = #tpu.pipeline_mode<synchronous>, transform_indices = @transform_4, window_bounds = array<i64: 1, 128>}, {pipeline_mode = #tpu.pipeline_mode<synchronous>, transform_indices = @transform_5, window_bounds = array<i64: 32, 128>}, {pipeline_mode = #tpu.pipeline_mode<synchronous>, transform_indices = @transform_6, window_bounds = array<i64: 1, 128>}, {transform_indices = @transform_7, window_bounds = array<i64: 8, 8, 128>}]} {
    %c0 = arith.constant 0 : index
    %c0_0 = arith.constant 0 : index
    %c0_1 = arith.constant 0 : index
    %0 = vector.load %arg1[%c0, %c0_0, %c0_1] : memref<8x8x32xf32, #tpu.memory_space<vmem>>, vector<8x8x32xf32>
    %1 = vector.shape_cast %0 : vector<8x8x32xf32> to vector<64x32xf32>
    %2 = arith.truncf %1 : vector<64x32xf32> to vector<64x32xbf16>
    %c0_2 = arith.constant 0 : index
    %c0_3 = arith.constant 0 : index
    %3 = vector.load %arg3[%c0_2, %c0_3] : memref<32x128xbf16, #tpu.memory_space<vmem>>, vector<32x128xbf16>
    %cst = arith.constant dense<0.000000e+00> : vector<64x128xf32>
    %4 = tpu.matmul %2, %3, %cst {dimension_numbers = #tpu.dot_dimension_numbers<[1], [0], [0], [1], [0, 0, 1, 1], [], []>} : vector<64x32xbf16>, vector<32x128xbf16>, vector<64x128xf32> -> vector<64x128xf32>
    %c0_4 = arith.constant 0 : index
    %c0_5 = arith.constant 0 : index
    %5 = vector.load %arg5[%c0_4, %c0_5] : memref<1x128xf32, #tpu.memory_space<vmem>>, vector<1x128xf32>
    %6 = vector.broadcast %5 : vector<1x128xf32> to vector<64x128xf32>
    %7 = arith.addf %4, %6 : vector<64x128xf32>
    %c0_6 = arith.constant 0 : index
    %c0_7 = arith.constant 0 : index
    %8 = vector.load %arg9[%c0_6, %c0_7] : memref<64x128xf32, #tpu.memory_space<vmem>>, vector<64x128xf32>
    tpu.vector_store %arg9[%c0_6, %c0_7], %7 {strides = array<i32>} : memref<64x128xf32, #tpu.memory_space<vmem>>, vector<64x128xf32>,
    %c0_8 = arith.constant 0 : index
    %c0_9 = arith.constant 0 : index
    %9 = vector.load %arg2[%c0_8, %c0_9] : memref<8x1xi32, #tpu.memory_space<vmem>>, vector<8x1xi32>
    %10 = vector.shape_cast %9 : vector<8x1xi32> to vector<8x1xi32>
    %11 = vector.broadcast %10 : vector<8x1xi32> to vector<8x32xi32>
    %cst_10 = arith.constant 0.000000e+00 : f32
    %12 = vector.broadcast %cst_10 : f32 to vector<8x32xf32>
    %c0_i32 = arith.constant 0 : i32
    %c8_i32 = arith.constant 8 : i32
    %13 = arith.muli %c0_i32, %c8_i32 : i32
    %14 = tpu.assume_multiple %13, 8 : i32
    %15 = arith.truncf %12 : vector<8x32xf32> to vector<8x32xbf16>
    %c0_11 = arith.constant 0 : index
    %c0_12 = arith.constant 0 : index
    %16 = vector.load %arg4[%c0_11, %c0_12] : memref<32x128xbf16, #tpu.memory_space<vmem>>, vector<32x128xbf16>
    %cst_13 = arith.constant dense<0.000000e+00> : vector<8x128xf32>
    %17 = tpu.matmul %15, %16, %cst_13 {dimension_numbers = #tpu.dot_dimension_numbers<[1], [0], [0], [1], [0, 0, 1, 1], [], []>} : vector<8x32xbf16>, vector<32x128xbf16>, vector<8x128xf32> -> vector<8x128xf32>
    %18 = arith.index_cast %14 : i32 to index
    %c0_14 = arith.constant 0 : index
    %19 = vector.load %arg9[%18, %c0_14] : memref<64x128xf32, #tpu.memory_space<vmem>>, vector<8x128xf32>
    %20 = arith.addf %17, %19 : vector<8x128xf32>
    %21 = vector.extract_strided_slice %20 {offsets = [0, 0], sizes = [8, 32], strides = [1, 1]} : vector<8x128xf32> to vector<8x32xf32>
    %22 = arith.negf %21 : vector<8x32xf32>
    %23 = math.exp %22 : vector<8x32xf32>
    %cst_15 = arith.constant 1.000000e+00 : f32
    %24 = vector.broadcast %cst_15 : f32 to vector<8x32xf32>
    %25 = arith.addf %24, %23 : vector<8x32xf32>
    %26 = arith.divf %24, %25 : vector<8x32xf32>
    %27 = vector.extract_strided_slice %20 {offsets = [0, 32], sizes = [8, 32], strides = [1, 1]} : vector<8x128xf32> to vector<8x32xf32>
    %28 = arith.negf %27 : vector<8x32xf32>
    %29 = math.exp %28 : vector<8x32xf32>
    %cst_16 = arith.constant 1.000000e+00 : f32
    %30 = vector.broadcast %cst_16 : f32 to vector<8x32xf32>
    %31 = arith.addf %30, %29 : vector<8x32xf32>
    %32 = arith.divf %30, %31 : vector<8x32xf32>
    %33 = vector.extract_strided_slice %20 {offsets = [0, 64], sizes = [8, 32], strides = [1, 1]} : vector<8x128xf32> to vector<8x32xf32>
    %34 = math.tanh %33 : vector<8x32xf32>
    %35 = vector.extract_strided_slice %20 {offsets = [0, 96], sizes = [8, 32], strides = [1, 1]} : vector<8x128xf32> to vector<8x32xf32>
    %36 = arith.negf %35 : vector<8x32xf32>
    %37 = math.exp %36 : vector<8x32xf32>
    %cst_17 = arith.constant 1.000000e+00 : f32
    %38 = vector.broadcast %cst_17 : f32 to vector<8x32xf32>
    %39 = arith.addf %38, %37 : vector<8x32xf32>
    %40 = arith.divf %38, %39 : vector<8x32xf32>
    %41 = arith.mulf %32, %12 : vector<8x32xf32>
    %42 = arith.mulf %26, %34 : vector<8x32xf32>
    %43 = arith.addf %41, %42 : vector<8x32xf32>
    %44 = math.tanh %43 : vector<8x32xf32>
    %45 = arith.mulf %40, %44 : vector<8x32xf32>
    %46 = vector.broadcast %c0_i32 : i32 to vector<8x32xi32>
    %47 = arith.cmpi sgt, %11, %46 : vector<8x32xi32>
    %48 = arith.select %47, %45, %12 : vector<8x32xi1>, vector<8x32xf32>
    %49 = arith.select %47, %43, %12 : vector<8x32xi1>, vector<8x32xf32>
    %cst_18 = arith.constant 0.000000e+00 : f32
    %50 = vector.broadcast %cst_18 : f32 to vector<8x32xf32>
    %51 = arith.select %47, %45, %50 : vector<8x32xi1>, vector<8x32xf32>
    %52 = arith.index_cast %14 : i32 to index
    %c0_19 = arith.constant 0 : index
    %53 = vector.load %arg10[%52, %c0_19] : memref<64x32xf32, #tpu.memory_space<vmem>>, vector<8x32xf32>
    tpu.vector_store %arg10[%52, %c0_19], %51 {strides = array<i32>} : memref<64x32xf32, #tpu.memory_space<vmem>>, vector<8x32xf32>,
    %c1_i32 = arith.constant 1 : i32
    %c8_i32_20 = arith.constant 8 : i32
    %54 = arith.muli %c1_i32, %c8_i32_20 : i32
    %55 = tpu.assume_multiple %54, 8 : i32
    %56 = arith.truncf %48 : vector<8x32xf32> to vector<8x32xbf16>
    %c0_21 = arith.constant 0 : index
    %c0_22 = arith.constant 0 : index
    %57 = vector.load %arg4[%c0_21, %c0_22] : memref<32x128xbf16, #tpu.memory_space<vmem>>, vector<32x128xbf16>
    %cst_23 = arith.constant dense<0.000000e+00> : vector<8x128xf32>
    %58 = tpu.matmul %56, %57, %cst_23 {dimension_numbers = #tpu.dot_dimension_numbers<[1], [0], [0], [1], [0, 0, 1, 1], [], []>} : vector<8x32xbf16>, vector<32x128xbf16>, vector<8x128xf32> -> vector<8x128xf32>
    %59 = arith.index_cast %55 : i32 to index
    %c0_24 = arith.constant 0 : index
    %60 = vector.load %arg9[%59, %c0_24] : memref<64x128xf32, #tpu.memory_space<vmem>>, vector<8x128xf32>
    %61 = arith.addf %58, %60 : vector<8x128xf32>
    %62 = vector.extract_strided_slice %61 {offsets = [0, 0], sizes = [8, 32], strides = [1, 1]} : vector<8x128xf32> to vector<8x32xf32>
    %63 = arith.negf %62 : vector<8x32xf32>
    %64 = math.exp %63 : vector<8x32xf32>
    %cst_25 = arith.constant 1.000000e+00 : f32
    %65 = vector.broadcast %cst_25 : f32 to vector<8x32xf32>
    %66 = arith.addf %65, %64 : vector<8x32xf32>
    %67 = arith.divf %65, %66 : vector<8x32xf32>
    %68 = vector.extract_strided_slice %61 {offsets = [0, 32], sizes = [8, 32], strides = [1, 1]} : vector<8x128xf32> to vector<8x32xf32>
    %69 = arith.negf %68 : vector<8x32xf32>
    %70 = math.exp %69 : vector<8x32xf32>
    %cst_26 = arith.constant 1.000000e+00 : f32
    %71 = vector.broadcast %cst_26 : f32 to vector<8x32xf32>
    %72 = arith.addf %71, %70 : vector<8x32xf32>
    %73 = arith.divf %71, %72 : vector<8x32xf32>
    %74 = vector.extract_strided_slice %61 {offsets = [0, 64], sizes = [8, 32], strides = [1, 1]} : vector<8x128xf32> to vector<8x32xf32>
    %75 = math.tanh %74 : vector<8x32xf32>
    %76 = vector.extract_strided_slice %61 {offsets = [0, 96], sizes = [8, 32], strides = [1, 1]} : vector<8x128xf32> to vector<8x32xf32>
    %77 = arith.negf %76 : vector<8x32xf32>
    %78 = math.exp %77 : vector<8x32xf32>
    %cst_27 = arith.constant 1.000000e+00 : f32
    %79 = vector.broadcast %cst_27 : f32 to vector<8x32xf32>
    %80 = arith.addf %79, %78 : vector<8x32xf32>
    %81 = arith.divf %79, %80 : vector<8x32xf32>
    %82 = arith.mulf %73, %49 : vector<8x32xf32>
    %83 = arith.mulf %67, %75 : vector<8x32xf32>
    %84 = arith.addf %82, %83 : vector<8x32xf32>
    %85 = math.tanh %84 : vector<8x32xf32>
    %86 = arith.mulf %81, %85 : vector<8x32xf32>
    %87 = vector.broadcast %c1_i32 : i32 to vector<8x32xi32>
    %88 = arith.cmpi sgt, %11, %87 : vector<8x32xi32>
    %89 = arith.select %88, %86, %48 : vector<8x32xi1>, vector<8x32xf32>
    %90 = arith.select %88, %84, %49 : vector<8x32xi1>, vector<8x32xf32>
    %cst_28 = arith.constant 0.000000e+00 : f32
    %91 = vector.broadcast %cst_28 : f32 to vector<8x32xf32>
    %92 = arith.select %88, %86, %91 : vector<8x32xi1>, vector<8x32xf32>
    %93 = arith.index_cast %55 : i32 to index
    %c0_29 = arith.constant 0 : index
    %94 = vector.load %arg10[%93, %c0_29] : memref<64x32xf32, #tpu.memory_space<vmem>>, vector<8x32xf32>
    tpu.vector_store %arg10[%93, %c0_29], %92 {strides = array<i32>} : memref<64x32xf32, #tpu.memory_space<vmem>>, vector<8x32xf32>,
    %c2_i32 = arith.constant 2 : i32
    %c8_i32_30 = arith.constant 8 : i32
    %95 = arith.muli %c2_i32, %c8_i32_30 : i32
    %96 = tpu.assume_multiple %95, 8 : i32
    %97 = arith.truncf %89 : vector<8x32xf32> to vector<8x32xbf16>
    %c0_31 = arith.constant 0 : index
    %c0_32 = arith.constant 0 : index
    %98 = vector.load %arg4[%c0_31, %c0_32] : memref<32x128xbf16, #tpu.memory_space<vmem>>, vector<32x128xbf16>
    %cst_33 = arith.constant dense<0.000000e+00> : vector<8x128xf32>
    %99 = tpu.matmul %97, %98, %cst_33 {dimension_numbers = #tpu.dot_dimension_numbers<[1], [0], [0], [1], [0, 0, 1, 1], [], []>} : vector<8x32xbf16>, vector<32x128xbf16>, vector<8x128xf32> -> vector<8x128xf32>
    %100 = arith.index_cast %96 : i32 to index
    %c0_34 = arith.constant 0 : index
    %101 = vector.load %arg9[%100, %c0_34] : memref<64x128xf32, #tpu.memory_space<vmem>>, vector<8x128xf32>
    %102 = arith.addf %99, %101 : vector<8x128xf32>
    %103 = vector.extract_strided_slice %102 {offsets = [0, 0], sizes = [8, 32], strides = [1, 1]} : vector<8x128xf32> to vector<8x32xf32>
    %104 = arith.negf %103 : vector<8x32xf32>
    %105 = math.exp %104 : vector<8x32xf32>
    %cst_35 = arith.constant 1.000000e+00 : f32
    %106 = vector.broadcast %cst_35 : f32 to vector<8x32xf32>
    %107 = arith.addf %106, %105 : vector<8x32xf32>
    %108 = arith.divf %106, %107 : vector<8x32xf32>
    %109 = vector.extract_strided_slice %102 {offsets = [0, 32], sizes = [8, 32], strides = [1, 1]} : vector<8x128xf32> to vector<8x32xf32>
    %110 = arith.negf %109 : vector<8x32xf32>
    %111 = math.exp %110 : vector<8x32xf32>
    %cst_36 = arith.constant 1.000000e+00 : f32
    %112 = vector.broadcast %cst_36 : f32 to vector<8x32xf32>
    %113 = arith.addf %112, %111 : vector<8x32xf32>
    %114 = arith.divf %112, %113 : vector<8x32xf32>
    %115 = vector.extract_strided_slice %102 {offsets = [0, 64], sizes = [8, 32], strides = [1, 1]} : vector<8x128xf32> to vector<8x32xf32>
    %116 = math.tanh %115 : vector<8x32xf32>
    %117 = vector.extract_strided_slice %102 {offsets = [0, 96], sizes = [8, 32], strides = [1, 1]} : vector<8x128xf32> to vector<8x32xf32>
    %118 = arith.negf %117 : vector<8x32xf32>
    %119 = math.exp %118 : vector<8x32xf32>
    %cst_37 = arith.constant 1.000000e+00 : f32
    %120 = vector.broadcast %cst_37 : f32 to vector<8x32xf32>
    %121 = arith.addf %120, %119 : vector<8x32xf32>
    %122 = arith.divf %120, %121 : vector<8x32xf32>
    %123 = arith.mulf %114, %90 : vector<8x32xf32>
    %124 = arith.mulf %108, %116 : vector<8x32xf32>
    %125 = arith.addf %123, %124 : vector<8x32xf32>
    %126 = math.tanh %125 : vector<8x32xf32>
    %127 = arith.mulf %122, %126 : vector<8x32xf32>
    %128 = vector.broadcast %c2_i32 : i32 to vector<8x32xi32>
    %129 = arith.cmpi sgt, %11, %128 : vector<8x32xi32>
    %130 = arith.select %129, %127, %89 : vector<8x32xi1>, vector<8x32xf32>
    %131 = arith.select %129, %125, %90 : vector<8x32xi1>, vector<8x32xf32>
    %cst_38 = arith.constant 0.000000e+00 : f32
    %132 = vector.broadcast %cst_38 : f32 to vector<8x32xf32>
    %133 = arith.select %129, %127, %132 : vector<8x32xi1>, vector<8x32xf32>
    %134 = arith.index_cast %96 : i32 to index
    %c0_39 = arith.constant 0 : index
    %135 = vector.load %arg10[%134, %c0_39] : memref<64x32xf32, #tpu.memory_space<vmem>>, vector<8x32xf32>
    tpu.vector_store %arg10[%134, %c0_39], %133 {strides = array<i32>} : memref<64x32xf32, #tpu.memory_space<vmem>>, vector<8x32xf32>,
    %c3_i32 = arith.constant 3 : i32
    %c8_i32_40 = arith.constant 8 : i32
    %136 = arith.muli %c3_i32, %c8_i32_40 : i32
    %137 = tpu.assume_multiple %136, 8 : i32
    %138 = arith.truncf %130 : vector<8x32xf32> to vector<8x32xbf16>
    %c0_41 = arith.constant 0 : index
    %c0_42 = arith.constant 0 : index
    %139 = vector.load %arg4[%c0_41, %c0_42] : memref<32x128xbf16, #tpu.memory_space<vmem>>, vector<32x128xbf16>
    %cst_43 = arith.constant dense<0.000000e+00> : vector<8x128xf32>
    %140 = tpu.matmul %138, %139, %cst_43 {dimension_numbers = #tpu.dot_dimension_numbers<[1], [0], [0], [1], [0, 0, 1, 1], [], []>} : vector<8x32xbf16>, vector<32x128xbf16>, vector<8x128xf32> -> vector<8x128xf32>
    %141 = arith.index_cast %137 : i32 to index
    %c0_44 = arith.constant 0 : index
    %142 = vector.load %arg9[%141, %c0_44] : memref<64x128xf32, #tpu.memory_space<vmem>>, vector<8x128xf32>
    %143 = arith.addf %140, %142 : vector<8x128xf32>
    %144 = vector.extract_strided_slice %143 {offsets = [0, 0], sizes = [8, 32], strides = [1, 1]} : vector<8x128xf32> to vector<8x32xf32>
    %145 = arith.negf %144 : vector<8x32xf32>
    %146 = math.exp %145 : vector<8x32xf32>
    %cst_45 = arith.constant 1.000000e+00 : f32
    %147 = vector.broadcast %cst_45 : f32 to vector<8x32xf32>
    %148 = arith.addf %147, %146 : vector<8x32xf32>
    %149 = arith.divf %147, %148 : vector<8x32xf32>
    %150 = vector.extract_strided_slice %143 {offsets = [0, 32], sizes = [8, 32], strides = [1, 1]} : vector<8x128xf32> to vector<8x32xf32>
    %151 = arith.negf %150 : vector<8x32xf32>
    %152 = math.exp %151 : vector<8x32xf32>
    %cst_46 = arith.constant 1.000000e+00 : f32
    %153 = vector.broadcast %cst_46 : f32 to vector<8x32xf32>
    %154 = arith.addf %153, %152 : vector<8x32xf32>
    %155 = arith.divf %153, %154 : vector<8x32xf32>
    %156 = vector.extract_strided_slice %143 {offsets = [0, 64], sizes = [8, 32], strides = [1, 1]} : vector<8x128xf32> to vector<8x32xf32>
    %157 = math.tanh %156 : vector<8x32xf32>
    %158 = vector.extract_strided_slice %143 {offsets = [0, 96], sizes = [8, 32], strides = [1, 1]} : vector<8x128xf32> to vector<8x32xf32>
    %159 = arith.negf %158 : vector<8x32xf32>
    %160 = math.exp %159 : vector<8x32xf32>
    %cst_47 = arith.constant 1.000000e+00 : f32
    %161 = vector.broadcast %cst_47 : f32 to vector<8x32xf32>
    %162 = arith.addf %161, %160 : vector<8x32xf32>
    %163 = arith.divf %161, %162 : vector<8x32xf32>
    %164 = arith.mulf %155, %131 : vector<8x32xf32>
    %165 = arith.mulf %149, %157 : vector<8x32xf32>
    %166 = arith.addf %164, %165 : vector<8x32xf32>
    %167 = math.tanh %166 : vector<8x32xf32>
    %168 = arith.mulf %163, %167 : vector<8x32xf32>
    %169 = vector.broadcast %c3_i32 : i32 to vector<8x32xi32>
    %170 = arith.cmpi sgt, %11, %169 : vector<8x32xi32>
    %171 = arith.select %170, %168, %130 : vector<8x32xi1>, vector<8x32xf32>
    %172 = arith.select %170, %166, %131 : vector<8x32xi1>, vector<8x32xf32>
    %cst_48 = arith.constant 0.000000e+00 : f32
    %173 = vector.broadcast %cst_48 : f32 to vector<8x32xf32>
    %174 = arith.select %170, %168, %173 : vector<8x32xi1>, vector<8x32xf32>
    %175 = arith.index_cast %137 : i32 to index
    %c0_49 = arith.constant 0 : index
    %176 = vector.load %arg10[%175, %c0_49] : memref<64x32xf32, #tpu.memory_space<vmem>>, vector<8x32xf32>
    tpu.vector_store %arg10[%175, %c0_49], %174 {strides = array<i32>} : memref<64x32xf32, #tpu.memory_space<vmem>>, vector<8x32xf32>,
    %c4_i32 = arith.constant 4 : i32
    %c8_i32_50 = arith.constant 8 : i32
    %177 = arith.muli %c4_i32, %c8_i32_50 : i32
    %178 = tpu.assume_multiple %177, 8 : i32
    %179 = arith.truncf %171 : vector<8x32xf32> to vector<8x32xbf16>
    %c0_51 = arith.constant 0 : index
    %c0_52 = arith.constant 0 : index
    %180 = vector.load %arg4[%c0_51, %c0_52] : memref<32x128xbf16, #tpu.memory_space<vmem>>, vector<32x128xbf16>
    %cst_53 = arith.constant dense<0.000000e+00> : vector<8x128xf32>
    %181 = tpu.matmul %179, %180, %cst_53 {dimension_numbers = #tpu.dot_dimension_numbers<[1], [0], [0], [1], [0, 0, 1, 1], [], []>} : vector<8x32xbf16>, vector<32x128xbf16>, vector<8x128xf32> -> vector<8x128xf32>
    %182 = arith.index_cast %178 : i32 to index
    %c0_54 = arith.constant 0 : index
    %183 = vector.load %arg9[%182, %c0_54] : memref<64x128xf32, #tpu.memory_space<vmem>>, vector<8x128xf32>
    %184 = arith.addf %181, %183 : vector<8x128xf32>
    %185 = vector.extract_strided_slice %184 {offsets = [0, 0], sizes = [8, 32], strides = [1, 1]} : vector<8x128xf32> to vector<8x32xf32>
    %186 = arith.negf %185 : vector<8x32xf32>
    %187 = math.exp %186 : vector<8x32xf32>
    %cst_55 = arith.constant 1.000000e+00 : f32
    %188 = vector.broadcast %cst_55 : f32 to vector<8x32xf32>
    %189 = arith.addf %188, %187 : vector<8x32xf32>
    %190 = arith.divf %188, %189 : vector<8x32xf32>
    %191 = vector.extract_strided_slice %184 {offsets = [0, 32], sizes = [8, 32], strides = [1, 1]} : vector<8x128xf32> to vector<8x32xf32>
    %192 = arith.negf %191 : vector<8x32xf32>
    %193 = math.exp %192 : vector<8x32xf32>
    %cst_56 = arith.constant 1.000000e+00 : f32
    %194 = vector.broadcast %cst_56 : f32 to vector<8x32xf32>
    %195 = arith.addf %194, %193 : vector<8x32xf32>
    %196 = arith.divf %194, %195 : vector<8x32xf32>
    %197 = vector.extract_strided_slice %184 {offsets = [0, 64], sizes = [8, 32], strides = [1, 1]} : vector<8x128xf32> to vector<8x32xf32>
    %198 = math.tanh %197 : vector<8x32xf32>
    %199 = vector.extract_strided_slice %184 {offsets = [0, 96], sizes = [8, 32], strides = [1, 1]} : vector<8x128xf32> to vector<8x32xf32>
    %200 = arith.negf %199 : vector<8x32xf32>
    %201 = math.exp %200 : vector<8x32xf32>
    %cst_57 = arith.constant 1.000000e+00 : f32
    %202 = vector.broadcast %cst_57 : f32 to vector<8x32xf32>
    %203 = arith.addf %202, %201 : vector<8x32xf32>
    %204 = arith.divf %202, %203 : vector<8x32xf32>
    %205 = arith.mulf %196, %172 : vector<8x32xf32>
    %206 = arith.mulf %190, %198 : vector<8x32xf32>
    %207 = arith.addf %205, %206 : vector<8x32xf32>
    %208 = math.tanh %207 : vector<8x32xf32>
    %209 = arith.mulf %204, %208 : vector<8x32xf32>
    %210 = vector.broadcast %c4_i32 : i32 to vector<8x32xi32>
    %211 = arith.cmpi sgt, %11, %210 : vector<8x32xi32>
    %212 = arith.select %211, %209, %171 : vector<8x32xi1>, vector<8x32xf32>
    %213 = arith.select %211, %207, %172 : vector<8x32xi1>, vector<8x32xf32>
    %cst_58 = arith.constant 0.000000e+00 : f32
    %214 = vector.broadcast %cst_58 : f32 to vector<8x32xf32>
    %215 = arith.select %211, %209, %214 : vector<8x32xi1>, vector<8x32xf32>
    %216 = arith.index_cast %178 : i32 to index
    %c0_59 = arith.constant 0 : index
    %217 = vector.load %arg10[%216, %c0_59] : memref<64x32xf32, #tpu.memory_space<vmem>>, vector<8x32xf32>
    tpu.vector_store %arg10[%216, %c0_59], %215 {strides = array<i32>} : memref<64x32xf32, #tpu.memory_space<vmem>>, vector<8x32xf32>,
    %c5_i32 = arith.constant 5 : i32
    %c8_i32_60 = arith.constant 8 : i32
    %218 = arith.muli %c5_i32, %c8_i32_60 : i32
    %219 = tpu.assume_multiple %218, 8 : i32
    %220 = arith.truncf %212 : vector<8x32xf32> to vector<8x32xbf16>
    %c0_61 = arith.constant 0 : index
    %c0_62 = arith.constant 0 : index
    %221 = vector.load %arg4[%c0_61, %c0_62] : memref<32x128xbf16, #tpu.memory_space<vmem>>, vector<32x128xbf16>
    %cst_63 = arith.constant dense<0.000000e+00> : vector<8x128xf32>
    %222 = tpu.matmul %220, %221, %cst_63 {dimension_numbers = #tpu.dot_dimension_numbers<[1], [0], [0], [1], [0, 0, 1, 1], [], []>} : vector<8x32xbf16>, vector<32x128xbf16>, vector<8x128xf32> -> vector<8x128xf32>
    %223 = arith.index_cast %219 : i32 to index
    %c0_64 = arith.constant 0 : index
    %224 = vector.load %arg9[%223, %c0_64] : memref<64x128xf32, #tpu.memory_space<vmem>>, vector<8x128xf32>
    %225 = arith.addf %222, %224 : vector<8x128xf32>
    %226 = vector.extract_strided_slice %225 {offsets = [0, 0], sizes = [8, 32], strides = [1, 1]} : vector<8x128xf32> to vector<8x32xf32>
    %227 = arith.negf %226 : vector<8x32xf32>
    %228 = math.exp %227 : vector<8x32xf32>
    %cst_65 = arith.constant 1.000000e+00 : f32
    %229 = vector.broadcast %cst_65 : f32 to vector<8x32xf32>
    %230 = arith.addf %229, %228 : vector<8x32xf32>
    %231 = arith.divf %229, %230 : vector<8x32xf32>
    %232 = vector.extract_strided_slice %225 {offsets = [0, 32], sizes = [8, 32], strides = [1, 1]} : vector<8x128xf32> to vector<8x32xf32>
    %233 = arith.negf %232 : vector<8x32xf32>
    %234 = math.exp %233 : vector<8x32xf32>
    %cst_66 = arith.constant 1.000000e+00 : f32
    %235 = vector.broadcast %cst_66 : f32 to vector<8x32xf32>
    %236 = arith.addf %235, %234 : vector<8x32xf32>
    %237 = arith.divf %235, %236 : vector<8x32xf32>
    %238 = vector.extract_strided_slice %225 {offsets = [0, 64], sizes = [8, 32], strides = [1, 1]} : vector<8x128xf32> to vector<8x32xf32>
    %239 = math.tanh %238 : vector<8x32xf32>
    %240 = vector.extract_strided_slice %225 {offsets = [0, 96], sizes = [8, 32], strides = [1, 1]} : vector<8x128xf32> to vector<8x32xf32>
    %241 = arith.negf %240 : vector<8x32xf32>
    %242 = math.exp %241 : vector<8x32xf32>
    %cst_67 = arith.constant 1.000000e+00 : f32
    %243 = vector.broadcast %cst_67 : f32 to vector<8x32xf32>
    %244 = arith.addf %243, %242 : vector<8x32xf32>
    %245 = arith.divf %243, %244 : vector<8x32xf32>
    %246 = arith.mulf %237, %213 : vector<8x32xf32>
    %247 = arith.mulf %231, %239 : vector<8x32xf32>
    %248 = arith.addf %246, %247 : vector<8x32xf32>
    %249 = math.tanh %248 : vector<8x32xf32>
    %250 = arith.mulf %245, %249 : vector<8x32xf32>
    %251 = vector.broadcast %c5_i32 : i32 to vector<8x32xi32>
    %252 = arith.cmpi sgt, %11, %251 : vector<8x32xi32>
    %253 = arith.select %252, %250, %212 : vector<8x32xi1>, vector<8x32xf32>
    %254 = arith.select %252, %248, %213 : vector<8x32xi1>, vector<8x32xf32>
    %cst_68 = arith.constant 0.000000e+00 : f32
    %255 = vector.broadcast %cst_68 : f32 to vector<8x32xf32>
    %256 = arith.select %252, %250, %255 : vector<8x32xi1>, vector<8x32xf32>
    %257 = arith.index_cast %219 : i32 to index
    %c0_69 = arith.constant 0 : index
    %258 = vector.load %arg10[%257, %c0_69] : memref<64x32xf32, #tpu.memory_space<vmem>>, vector<8x32xf32>
    tpu.vector_store %arg10[%257, %c0_69], %256 {strides = array<i32>} : memref<64x32xf32, #tpu.memory_space<vmem>>, vector<8x32xf32>,
    %c6_i32 = arith.constant 6 : i32
    %c8_i32_70 = arith.constant 8 : i32
    %259 = arith.muli %c6_i32, %c8_i32_70 : i32
    %260 = tpu.assume_multiple %259, 8 : i32
    %261 = arith.truncf %253 : vector<8x32xf32> to vector<8x32xbf16>
    %c0_71 = arith.constant 0 : index
    %c0_72 = arith.constant 0 : index
    %262 = vector.load %arg4[%c0_71, %c0_72] : memref<32x128xbf16, #tpu.memory_space<vmem>>, vector<32x128xbf16>
    %cst_73 = arith.constant dense<0.000000e+00> : vector<8x128xf32>
    %263 = tpu.matmul %261, %262, %cst_73 {dimension_numbers = #tpu.dot_dimension_numbers<[1], [0], [0], [1], [0, 0, 1, 1], [], []>} : vector<8x32xbf16>, vector<32x128xbf16>, vector<8x128xf32> -> vector<8x128xf32>
    %264 = arith.index_cast %260 : i32 to index
    %c0_74 = arith.constant 0 : index
    %265 = vector.load %arg9[%264, %c0_74] : memref<64x128xf32, #tpu.memory_space<vmem>>, vector<8x128xf32>
    %266 = arith.addf %263, %265 : vector<8x128xf32>
    %267 = vector.extract_strided_slice %266 {offsets = [0, 0], sizes = [8, 32], strides = [1, 1]} : vector<8x128xf32> to vector<8x32xf32>
    %268 = arith.negf %267 : vector<8x32xf32>
    %269 = math.exp %268 : vector<8x32xf32>
    %cst_75 = arith.constant 1.000000e+00 : f32
    %270 = vector.broadcast %cst_75 : f32 to vector<8x32xf32>
    %271 = arith.addf %270, %269 : vector<8x32xf32>
    %272 = arith.divf %270, %271 : vector<8x32xf32>
    %273 = vector.extract_strided_slice %266 {offsets = [0, 32], sizes = [8, 32], strides = [1, 1]} : vector<8x128xf32> to vector<8x32xf32>
    %274 = arith.negf %273 : vector<8x32xf32>
    %275 = math.exp %274 : vector<8x32xf32>
    %cst_76 = arith.constant 1.000000e+00 : f32
    %276 = vector.broadcast %cst_76 : f32 to vector<8x32xf32>
    %277 = arith.addf %276, %275 : vector<8x32xf32>
    %278 = arith.divf %276, %277 : vector<8x32xf32>
    %279 = vector.extract_strided_slice %266 {offsets = [0, 64], sizes = [8, 32], strides = [1, 1]} : vector<8x128xf32> to vector<8x32xf32>
    %280 = math.tanh %279 : vector<8x32xf32>
    %281 = vector.extract_strided_slice %266 {offsets = [0, 96], sizes = [8, 32], strides = [1, 1]} : vector<8x128xf32> to vector<8x32xf32>
    %282 = arith.negf %281 : vector<8x32xf32>
    %283 = math.exp %282 : vector<8x32xf32>
    %cst_77 = arith.constant 1.000000e+00 : f32
    %284 = vector.broadcast %cst_77 : f32 to vector<8x32xf32>
    %285 = arith.addf %284, %283 : vector<8x32xf32>
    %286 = arith.divf %284, %285 : vector<8x32xf32>
    %287 = arith.mulf %278, %254 : vector<8x32xf32>
    %288 = arith.mulf %272, %280 : vector<8x32xf32>
    %289 = arith.addf %287, %288 : vector<8x32xf32>
    %290 = math.tanh %289 : vector<8x32xf32>
    %291 = arith.mulf %286, %290 : vector<8x32xf32>
    %292 = vector.broadcast %c6_i32 : i32 to vector<8x32xi32>
    %293 = arith.cmpi sgt, %11, %292 : vector<8x32xi32>
    %294 = arith.select %293, %291, %253 : vector<8x32xi1>, vector<8x32xf32>
    %295 = arith.select %293, %289, %254 : vector<8x32xi1>, vector<8x32xf32>
    %cst_78 = arith.constant 0.000000e+00 : f32
    %296 = vector.broadcast %cst_78 : f32 to vector<8x32xf32>
    %297 = arith.select %293, %291, %296 : vector<8x32xi1>, vector<8x32xf32>
    %298 = arith.index_cast %260 : i32 to index
    %c0_79 = arith.constant 0 : index
    %299 = vector.load %arg10[%298, %c0_79] : memref<64x32xf32, #tpu.memory_space<vmem>>, vector<8x32xf32>
    tpu.vector_store %arg10[%298, %c0_79], %297 {strides = array<i32>} : memref<64x32xf32, #tpu.memory_space<vmem>>, vector<8x32xf32>,
    %c7_i32 = arith.constant 7 : i32
    %c8_i32_80 = arith.constant 8 : i32
    %300 = arith.muli %c7_i32, %c8_i32_80 : i32
    %301 = tpu.assume_multiple %300, 8 : i32
    %302 = arith.truncf %294 : vector<8x32xf32> to vector<8x32xbf16>
    %c0_81 = arith.constant 0 : index
    %c0_82 = arith.constant 0 : index
    %303 = vector.load %arg4[%c0_81, %c0_82] : memref<32x128xbf16, #tpu.memory_space<vmem>>, vector<32x128xbf16>
    %cst_83 = arith.constant dense<0.000000e+00> : vector<8x128xf32>
    %304 = tpu.matmul %302, %303, %cst_83 {dimension_numbers = #tpu.dot_dimension_numbers<[1], [0], [0], [1], [0, 0, 1, 1], [], []>} : vector<8x32xbf16>, vector<32x128xbf16>, vector<8x128xf32> -> vector<8x128xf32>
    %305 = arith.index_cast %301 : i32 to index
    %c0_84 = arith.constant 0 : index
    %306 = vector.load %arg9[%305, %c0_84] : memref<64x128xf32, #tpu.memory_space<vmem>>, vector<8x128xf32>
    %307 = arith.addf %304, %306 : vector<8x128xf32>
    %308 = vector.extract_strided_slice %307 {offsets = [0, 0], sizes = [8, 32], strides = [1, 1]} : vector<8x128xf32> to vector<8x32xf32>
    %309 = arith.negf %308 : vector<8x32xf32>
    %310 = math.exp %309 : vector<8x32xf32>
    %cst_85 = arith.constant 1.000000e+00 : f32
    %311 = vector.broadcast %cst_85 : f32 to vector<8x32xf32>
    %312 = arith.addf %311, %310 : vector<8x32xf32>
    %313 = arith.divf %311, %312 : vector<8x32xf32>
    %314 = vector.extract_strided_slice %307 {offsets = [0, 32], sizes = [8, 32], strides = [1, 1]} : vector<8x128xf32> to vector<8x32xf32>
    %315 = arith.negf %314 : vector<8x32xf32>
    %316 = math.exp %315 : vector<8x32xf32>
    %cst_86 = arith.constant 1.000000e+00 : f32
    %317 = vector.broadcast %cst_86 : f32 to vector<8x32xf32>
    %318 = arith.addf %317, %316 : vector<8x32xf32>
    %319 = arith.divf %317, %318 : vector<8x32xf32>
    %320 = vector.extract_strided_slice %307 {offsets = [0, 64], sizes = [8, 32], strides = [1, 1]} : vector<8x128xf32> to vector<8x32xf32>
    %321 = math.tanh %320 : vector<8x32xf32>
    %322 = vector.extract_strided_slice %307 {offsets = [0, 96], sizes = [8, 32], strides = [1, 1]} : vector<8x128xf32> to vector<8x32xf32>
    %323 = arith.negf %322 : vector<8x32xf32>
    %324 = math.exp %323 : vector<8x32xf32>
    %cst_87 = arith.constant 1.000000e+00 : f32
    %325 = vector.broadcast %cst_87 : f32 to vector<8x32xf32>
    %326 = arith.addf %325, %324 : vector<8x32xf32>
    %327 = arith.divf %325, %326 : vector<8x32xf32>
    %328 = arith.mulf %319, %295 : vector<8x32xf32>
    %329 = arith.mulf %313, %321 : vector<8x32xf32>
    %330 = arith.addf %328, %329 : vector<8x32xf32>
    %331 = math.tanh %330 : vector<8x32xf32>
    %332 = arith.mulf %327, %331 : vector<8x32xf32>
    %333 = vector.broadcast %c7_i32 : i32 to vector<8x32xi32>
    %334 = arith.cmpi sgt, %11, %333 : vector<8x32xi32>
    %335 = arith.select %334, %332, %294 : vector<8x32xi1>, vector<8x32xf32>
    %336 = arith.select %334, %330, %295 : vector<8x32xi1>, vector<8x32xf32>
    %cst_88 = arith.constant 0.000000e+00 : f32
    %337 = vector.broadcast %cst_88 : f32 to vector<8x32xf32>
    %338 = arith.select %334, %332, %337 : vector<8x32xi1>, vector<8x32xf32>
    %339 = arith.index_cast %301 : i32 to index
    %c0_89 = arith.constant 0 : index
    %340 = vector.load %arg10[%339, %c0_89] : memref<64x32xf32, #tpu.memory_space<vmem>>, vector<8x32xf32>
    tpu.vector_store %arg10[%339, %c0_89], %338 {strides = array<i32>} : memref<64x32xf32, #tpu.memory_space<vmem>>, vector<8x32xf32>,
    %c8_i32_90 = arith.constant 8 : i32
    %c0_91 = arith.constant 0 : index
    %c0_92 = arith.constant 0 : index
    %341 = vector.load %arg10[%c0_91, %c0_92] : memref<64x32xf32, #tpu.memory_space<vmem>>, vector<64x32xf32>
    %342 = arith.truncf %341 : vector<64x32xf32> to vector<64x32xbf16>
    %c0_93 = arith.constant 0 : index
    %c0_94 = arith.constant 0 : index
    %343 = vector.load %arg6[%c0_93, %c0_94] : memref<32x128xbf16, #tpu.memory_space<vmem>>, vector<32x128xbf16>
    %cst_95 = arith.constant dense<0.000000e+00> : vector<64x128xf32>
    %344 = tpu.matmul %342, %343, %cst_95 {dimension_numbers = #tpu.dot_dimension_numbers<[1], [0], [0], [1], [0, 0, 1, 1], [], []>} : vector<64x32xbf16>, vector<32x128xbf16>, vector<64x128xf32> -> vector<64x128xf32>
    %c0_96 = arith.constant 0 : index
    %c0_97 = arith.constant 0 : index
    %345 = vector.load %arg7[%c0_96, %c0_97] : memref<1x128xf32, #tpu.memory_space<vmem>>, vector<1x128xf32>
    %346 = vector.broadcast %345 : vector<1x128xf32> to vector<64x128xf32>
    %347 = arith.addf %344, %346 : vector<64x128xf32>
    %cst_98 = arith.constant dense<0xFF800000> : vector<64xf32>
    %348 = vector.multi_reduction <maximumf>, %347, %cst_98 [1] : vector<64x128xf32> to vector<64xf32>
    %349 = vector.shape_cast %348 : vector<64xf32> to vector<64x1xf32>
    %350 = vector.broadcast %349 : vector<64x1xf32> to vector<64x128xf32>
    %351 = arith.subf %347, %350 : vector<64x128xf32>
    %352 = math.exp %351 : vector<64x128xf32>
    %cst_99 = arith.constant dense<0.000000e+00> : vector<64xf32>
    %353 = vector.multi_reduction <add>, %352, %cst_99 [1] : vector<64x128xf32> to vector<64xf32>
    %354 = vector.shape_cast %353 : vector<64xf32> to vector<64x1xf32>
    %355 = math.log %354 : vector<64x1xf32>
    %356 = arith.addf %355, %349 : vector<64x1xf32>
    %357 = vector.broadcast %356 : vector<64x1xf32> to vector<64x128xf32>
    %358 = arith.subf %347, %357 : vector<64x128xf32>
    %359 = vector.shape_cast %358 : vector<64x128xf32> to vector<8x8x128xf32>
    %c0_100 = arith.constant 0 : index
    %c0_101 = arith.constant 0 : index
    %c0_102 = arith.constant 0 : index
    %360 = vector.load %arg8[%c0_100, %c0_101, %c0_102] : memref<8x8x128xf32, #tpu.memory_space<vmem>>, vector<8x8x128xf32>
    tpu.vector_store %arg8[%c0_100, %c0_101, %c0_102], %359 {strides = array<i32>} : memref<8x8x128xf32, #tpu.memory_space<vmem>>, vector<8x8x128xf32>,
    return
  }
  func.func @transform_0(%arg0: i32) -> (i32, i32, i32) {
    %c0_i32 = arith.constant 0 : i32
    %c0_i32_0 = arith.constant 0 : i32
    %c0_i32_1 = arith.constant 0 : i32
    return %c0_i32, %arg0, %c0_i32_0 : i32, i32, i32
  }
  func.func @transform_1(%arg0: i32) -> (i32, i32) {
    %c0_i32 = arith.constant 0 : i32
    %c0_i32_0 = arith.constant 0 : i32
    return %arg0, %c0_i32 : i32, i32
  }
  func.func @transform_2(%arg0: i32) -> (i32, i32) {
    %c0_i32 = arith.constant 0 : i32
    %c0_i32_0 = arith.constant 0 : i32
    %c0_i32_1 = arith.constant 0 : i32
    return %c0_i32, %c0_i32_0 : i32, i32
  }
  func.func @transform_3(%arg0: i32) -> (i32, i32) {
    %c0_i32 = arith.constant 0 : i32
    %c0_i32_0 = arith.constant 0 : i32
    %c0_i32_1 = arith.constant 0 : i32
    return %c0_i32, %c0_i32_0 : i32, i32
  }
  func.func @transform_4(%arg0: i32) -> (i32, i32) {
    %c0_i32 = arith.constant 0 : i32
    %c0_i32_0 = arith.constant 0 : i32
    %c0_i32_1 = arith.constant 0 : i32
    return %c0_i32, %c0_i32_0 : i32, i32
  }
  func.func @transform_5(%arg0: i32) -> (i32, i32) {
    %c0_i32 = arith.constant 0 : i32
    %c0_i32_0 = arith.constant 0 : i32
    %c0_i32_1 = arith.constant 0 : i32
    return %c0_i32, %c0_i32_0 : i32, i32
  }
  func.func @transform_6(%arg0: i32) -> (i32, i32) {
    %c0_i32 = arith.constant 0 : i32
    %c0_i32_0 = arith.constant 0 : i32
    %c0_i32_1 = arith.constant 0 : i32
    return %c0_i32, %c0_i32_0 : i32, i32
  }
  func.func @transform_7(%arg0: i32) -> (i32, i32, i32) {
    %c0_i32 = arith.constant 0 : i32
    %c0_i32_0 = arith.constant 0 : i32
    %c0_i32_1 = arith.constant 0 : i32
    return %c0_i32, %arg0, %c0_i32_0 : i32, i32, i32
  }
}

</mosaic_0001>

<bundles_post_ra>
// kernel: tpu_custom_call.1
= control target key start
LH: loop header
LB: loop body
LE: loop exit
PB: predicated region body
PF: predicated region fallthrough
CT: control target
= control target key end

     0   :  { %12 = vsyncpa [#allocation5], 0  ;;  %s1971_s0 = inlined_call_operand.hbm [shape: f32[8,8,32], index: 0, kind: input, shape index: {}]   ;;  %s1972_s1 = inlined_call_operand.vmem [shape: s32[8,1], index: 1, kind: input, shape index: {}]   ;;  %s1973_s2 = inlined_call_operand.vmem [shape: bf16[32,128], index: 2, kind: input, shape index: {}]   ;;  %s1974_s3 = inlined_call_operand.hbm [shape: bf16[32,128], index: 3, kind: input, shape index: {}]   ;;  %s1975_s4 = inlined_call_operand.vmem [shape: f32[1,128], index: 4, kind: input, shape index: {}]   ;;  %s1976_s5 = inlined_call_operand.hbm [shape: bf16[32,128], index: 5, kind: input, shape index: {}]   ;;  %s1977_s6 = inlined_call_operand.vmem [shape: f32[1,128], index: 6, kind: input, shape index: {}]   ;;  %s1978_s7 = inlined_call_operand.hbm [shape: f32[8,8,128], index: 7, kind: output, shape index: {}]  }
   0x1   :  { %13 = vsyncpa [#allocation8], 0 }
   0x2   :  { %14 = vsyncpa [#allocation6], 0  ;;  %s1600_s24 = smov [#allocation7]   ;;  %s1506_s28 = scalar_lea.hbm %s1974_s3, 256 }
   0x3   :  { %s36_s25 = sshll.u32 %s1600_s24, 4  ;;  %p1507_p0 = scmp.ne.s32.totalorder %s1974_s3, %s1506_s28  ;;  %s37_s25 = int_to_ptr.vmem [resolvable:$true] %s36_s25 }
   0x4   :  { %p1510_p1 = scmp.lt.u32.totalorder %s1506_s28, %s1974_s3 }
   0x6   :  { %p1512_p2 = pnand %p1510_p1, %p1507_p0 }
   0x8   :  { %1515 = shalt.err (!%p1512_p2)
}
   0x9   :  { %s1516_s10 = scalar_lea.vmem %s37_s25, 256  ;;  %p1521_p4 = scmp.lt.s32.totalorder %s37_s25, %s37_s25 }
   0xa   :  { %p1517_p3 = scmp.ne.s32.totalorder %s37_s25, %s1516_s10  ;;  %p1522_p5 = scmp.lt.s32.totalorder %s1516_s10, %s1516_s10 }
   0xc   :  { %p1523_p6 = por %p1522_p5, %p1521_p4 }
   0xe   :  { %p1524_p7 = pnand %p1523_p6, %p1517_p3 }
  0x10   :  { %1527 = shalt.err (!%p1524_p7)
}
  0x11   :  { %s1601_s11 = smov 64   ;;  %s1602_s12 = smov 4  }
  0x12   :  { %42 = dma.hbm_to_vmem [thread:$0]  %s1974_s3, 256, %s37_s25, [#allocation8], %s1601_s11, %s1601_s11, %s1602_s12  }
  0x13   :  { %s1603_s15 = smov [#allocation4]   ;;  %s1528_s19 = scalar_lea.hbm %s1971_s0, 1024 }
  0x14   :  { %s20_s16 = sshll.u32 %s1603_s15, 4  ;;  %p1529_p8 = scmp.ne.s32.totalorder %s1971_s0, %s1528_s19  ;;  %s21_s16 = int_to_ptr.vmem [resolvable:$true] %s20_s16 }
  0x15   :  { %p1532_p9 = scmp.lt.u32.totalorder %s1528_s19, %s1971_s0 }
  0x17   :  { %p1534_p10 = pnand %p1532_p9, %p1529_p8 }
  0x19   :  { %1537 = shalt.err (!%p1534_p10)
}
  0x1a   :  { %s1538_s24 = scalar_lea.vmem %s21_s16, 1024  ;;  %p1543_p12 = scmp.lt.s32.totalorder %s21_s16, %s21_s16 }
  0x1b   :  { %p1539_p11 = scmp.ne.s32.totalorder %s21_s16, %s1538_s24  ;;  %p1544_p13 = scmp.lt.s32.totalorder %s1538_s24, %s1538_s24 }
  0x1d   :  { %p1545_p0 = por %p1544_p13, %p1543_p12 }
  0x1f   :  { %p1546_p1 = pnand %p1545_p0, %p1539_p11 }
  0x21   :  { %1549 = shalt.err (!%p1546_p1)
}
  0x22   :  { %s1604_s3 = smov 128   ;;  %s1605_s25 = smov 8  }
  0x23   :  { %26 = dma.hbm_to_vmem [thread:$0]  %s1971_s0, 1024, %s21_s16, [#allocation5], %s1604_s3, %s1604_s3, %s1605_s25  }
  0x24   :  { %s1606_s28 = smov [#allocation9]   ;;  %s1550_s9 = scalar_lea.hbm %s1976_s5, 256 }
  0x25   :  { %s50_s29 = sshll.u32 %s1606_s28, 4  ;;  %p1551_p2 = scmp.ne.s32.totalorder %s1976_s5, %s1550_s9  ;;  %s51_s29 = int_to_ptr.vmem [resolvable:$true] %s50_s29 }
  0x26   :  { %p1554_p3 = scmp.lt.u32.totalorder %s1550_s9, %s1976_s5 }
  0x28   :  { %p1556_p4 = pnand %p1554_p3, %p1551_p2 }
  0x2a   :  { %1559 = shalt.err (!%p1556_p4)
}
  0x2b   :  { %s1560_s17 = scalar_lea.vmem %s51_s29, 256  ;;  %p1565_p6 = scmp.lt.s32.totalorder %s51_s29, %s51_s29 }
  0x2c   :  { %p1561_p5 = scmp.ne.s32.totalorder %s51_s29, %s1560_s17  ;;  %p1566_p7 = scmp.lt.s32.totalorder %s1560_s17, %s1560_s17 }
  0x2e   :  { %p1567_p8 = por %p1566_p7, %p1565_p6 }
  0x30   :  { %p1568_p9 = pnand %p1567_p8, %p1561_p5 }
  0x32   :  { %1571 = shalt.err (!%p1568_p9)
}
  0x33   :  { %56 = dma.hbm_to_vmem [thread:$0]  %s1976_s5, 256, %s51_s29, [#allocation8], %s1601_s11, %s1601_s11, %s1602_s12  }
  0x34   :  { %1594 = dma.done.wait [#allocation5], 1024  }
  0x35   :  { %1595 = vsyncadd [#allocation5], 4294966272 }
  0x36   :  { %1596 = dma.done.wait [#allocation8], 512  }
  0x37   :  { %1597 = vsyncadd [#allocation8], 4294966784  ;;  %v1607_v0 = vmov 0   ;;  %v1390_v1 = vld [vmem:[%s1973_s2] sm:$0xff]   ;;  %v1391_v2 = vld [vmem:[%s1973_s2 + $0x8] sm:$0xff]   ;;  %vm104_vm0 = vcmask 261120  }
  0x38   :  { %1388 = vset.pattern.permute.xlu1 %v1607_v0  ;;  %1389 = vset.pattern.permute.xlu0 %v1607_v0  ;;  %v73_v3 = vld [vmem:[#allocation4 + $0x20] sm:$0xff]  ;;  %v74_v4 = vld [vmem:[#allocation4 + $0x28] sm:$0xff]  ;;  %v75_v5 = vld [vmem:[#allocation4 + $0x30] sm:$0xff]  ;;  %v1608_v16 = vmov 0.0   ;;  %vm1609_vm1 = vmmov 0  }
  0x39   :  { %1372 = vmatprep.subr.bf16.mxu1 %v1390_v1  ;;  %1284 = vmatprep.subr.bf16.mxu0 %v1390_v1  ;;  %v79_v6 = vpack.c.bf16 %v74_v4, %v73_v3  ;;  %v76_v7 = vld [vmem:[#allocation4 + $0x38] sm:$0xff]  ;;  %v69_v8 = vld [vmem:[#allocation4] sm:$0xff]  ;;  %v70_v9 = vld [vmem:[#allocation4 + $0x8] sm:$0xff] }
  0x3a   :  { %1374 = vmatpush3.bf16.msra.mxu1 %v1390_v1  ;;  %1285 = vmatpush3.bf16.msra.mxu0 %v1390_v1  ;;  %v77_v10 = vpack.c.bf16 %v70_v9, %v69_v8  ;;  %v71_v11 = vld [vmem:[#allocation4 + $0x10] sm:$0xff]  ;;  %v72_v12 = vld [vmem:[#allocation4 + $0x18] sm:$0xff]  ;;  %v80_v13 = vpack.c.bf16 %v76_v7, %v75_v5  ;;  %v1392_v14 = vld [vmem:[#allocation7] sm:$0xff]  }
  0x3b   :  { %1373 = vmatprep.subr.bf16.mxu1 %v1391_v2  ;;  %1286 = vmatprep.subr.bf16.mxu0 %v1391_v2  ;;  %v78_v15 = vpack.c.bf16 %v72_v12, %v71_v11  ;;  %v1393_v17 = vld [vmem:[#allocation7 + $0x8] sm:$0xff]   ;;  %v190_v18 = vld [vmem:[%s1972_s1] sm:$0xff]  ;;  %s1610_s1 = smov 32  }
  0x3c   :  { %1292 = vmatprep.mubr.msk.bf16.mxu1 %vm104_vm0, %v79_v6  ;;  %1288 = vmatprep.mubr.msk.bf16.mxu0 %vm104_vm0, %v77_v10  ;;  %v1203_v19 = vld [vmem:[%s1975_s4] ss:$0 sm:$0xff]  ;;  %v1395_v52 = vld [vmem:[#allocation7 + $0x8] sm:$0xff]  }
  0x3d   :  { %192 = vperm.xlu1 %1388, %v190_v18   ;;  %v1394_v51 = vld [vmem:[#allocation7] sm:$0xff]  }
  0x3e   :  { %1375 = vmatpush3.bf16.msra.mxu1 %v1391_v2  ;;  %1287 = vmatpush3.bf16.msra.mxu0 %v1391_v2  ;;  %v1396_v12 = vld [vmem:[#allocation7] sm:$0xff]  }
  0x3f   :  { %1296 = vmatprep.subr.bf16.mxu1 %v1608_v16  ;;  %1312 = vmatprep.subr.bf16.mxu0 %v1608_v16 }
  0x41   :  { %1293 = vmatmul.mubr.msk.bf16.vlgmr.msra.gmra.mrb[0].mxu1 %vm104_vm0, %v80_v13  ;;  %1289 = vmatmul.mubr.msk.bf16.vlgmr.msra.gmra.mrb[0].mxu0 %vm104_vm0, %v78_v15  ;;  %v1397_v13 = vld [vmem:[#allocation7 + $0x8] sm:$0xff]  }
  0x42   :  { %1297 = vmatpush3.bf16.msra.mxu1 %v1392_v14  ;;  %1300 = vmatprep.mubr.msk.bf16.mxu1 %vm1609_vm1, %v1608_v16 }
  0x43   :  { %1298 = vmatprep.subr.bf16.mxu1 %v1608_v16  ;;  %1316 = vmatprep.mubr.msk.bf16.mxu0 %vm1609_vm1, %v1608_v16 }
  0x44   :  { %1313 = vmatpush3.bf16.msra.mxu0 %v1396_v12 }
  0x45   :  { %1314 = vmatprep.subr.bf16.mxu0 %v1608_v16 }
  0x46   :  { %1299 = vmatpush3.bf16.msra.mxu1 %v1393_v17 }
  0x47   :  { %1304 = vmatprep.subr.bf16.mxu1 %v1608_v16 }
  0x48   :  { %1315 = vmatpush3.bf16.msra.mxu0 %v1397_v13 }
  0x49   :  { %1301 = vmatmul.mubr.bf16.vlgmr.msra.gmra.mrb[4].mxu1 %v1607_v0  ;;  %1328 = vmatprep.subr.bf16.mxu0 %v1608_v16 }
  0x4a   :  { %1308 = vmatprep.mubr.msk.bf16.mxu1 %vm1609_vm1, %v1608_v16  ;;  %1305 = vmatpush3.bf16.msra.mxu1 %v1394_v51 }
  0x4b   :  { %1306 = vmatprep.subr.bf16.mxu1 %v1608_v16 }
  0x4e   :  { %1307 = vmatpush3.bf16.msra.mxu1 %v1395_v52 }
  0x4f   :  { %1320 = vmatprep.subr.bf16.mxu1 %v1608_v16 }
  0xbc   :  { %v1740_v54 = vpop.permute.xlu1 %192 }
  0xbd   :  { %vm278_vm2 = vcmp.gt.s32.totalorder %v1740_v54, 0  ;;  %vm375_vm3 = vcmp.gt.s32.totalorder %v1740_v54, 1  ;;  %vm474_vm4 = vcmp.gt.s32.totalorder %v1740_v54, 2  ;;  %vm573_vm5 = vcmp.gt.s32.totalorder %v1740_v54, 3 }
  0xbe   :  { %vm672_vm6 = vcmp.gt.s32.totalorder %v1740_v54, 4  ;;  %vm771_vm7 = vcmp.gt.s32.totalorder %v1740_v54, 5  ;;  %vm870_vm8 = vcmp.gt.s32.totalorder %v1740_v54, 6  ;;  %vm969_vm9 = vcmp.gt.s32.totalorder %v1740_v54, 7 }
 0x114   :  { %v1294_v20 = vpop.f32.mrb[0].mxu1  ;;  %v1290_v21 = vpop.f32.mrb[0].mxu0 }
 0x115   :  { %v1723_v22 = vadd.f32 %v1294_v20, %v1203_v19  ;;  %v167_v23 = vpop.f32.mrb[1].mxu1  ;;  %v1725_v24 = vadd.f32 %v1290_v21, %v1203_v19  ;;  %v151_v25 = vpop.f32.mrb[1].mxu0 }
 0x116   :  { %v1727_v26 = vadd.f32 %v1203_v19, %v167_v23  ;;  %v1295_v27 = vpop.f32.mrb[2].mxu1  ;;  %v1291_v28 = vpop.f32.mrb[2].mxu0  ;;  %v152_v35 = vadd.f32 %v1203_v19, %v151_v25 }
 0x117   :  { %v1729_v29 = vadd.f32 %v1295_v27, %v1203_v19  ;;  %v170_v30 = vpop.f32.mrb[3].mxu1  ;;  %v1731_v31 = vadd.f32 %v1291_v28, %v1203_v19  ;;  %v154_v32 = vpop.f32.mrb[3].mxu0 }
 0x118   :  { %v1733_v33 = vadd.f32 %v1203_v19, %v170_v30  ;;  %v155_v34 = vadd.f32 %v1203_v19, %v154_v32 }
 0x11c   :  { %v248_v36 = vpop.f32.mrb[4].mxu1 }
 0x11d   :  { %v249_v37 = vadd.f32 %v248_v36, %v152_v35  ;;  %v1302_v38 = vpop.f32.mrb[5].mxu1 }
 0x11e   :  { %v251_v39 = vpop.f32.mrb[6].mxu1 }
 0x11f   :  { %v1303_v40 = vpop.f32.mrb[7].mxu1  ;;  %1410 = vtanh.f32 %v249_v37  ;;  %v1212_v42 = vmul.f32 -1.442695, %v249_v37 }
 0x121   :  { %1412 = vpow2.f32 %v1212_v42  ;;  %v1398_v42 = vld [vmem:[#allocation7] sm:$0xff]  }
 0x129   :  { %v1411_v41 = vpop.eup %1410 }
 0x12a   :  { %263 = vrot.lane.b32.xlu0 %v1411_v41, %s1601_s11 }
 0x12b   :  { %v1413_v43 = vpop.eup %1412 }
 0x12c   :  { %v257_v44 = vadd.f32 1.0, %v1413_v43  ;;  %v1399_v43 = vld [vmem:[#allocation7 + $0x8] sm:$0xff]  }
 0x12e   :  { %1414 = vrcp.f32 %v257_v44 }
 0x138   :  { %v1415_v45 = vpop.eup %1414 }
 0x139   :  { %v261_v48 = vmul.f32 0.0, %v1415_v45 }
 0x19c   :  { %v264_v46 = vpop.permute.xlu0 %263 }
 0x19d   :  { %v266_v47 = vmul.f32 %v1415_v45, %v264_v46 }
 0x19f   :  { %268 = vrot.lane.b32.xlu0 %v266_v47, %s1610_s1 }
 0x211   :  { %v269_v49 = vpop.permute.xlu0 %268 }
 0x212   :  { %v271_v50 = vadd.f32 %v269_v49, %v261_v48 }
 0x214   :  { %1416 = vtanh.f32 %v271_v50  ;;  %v280_v8 = vsel %vm278_vm2, %v271_v50, 0.0 }
 0x21e   :  { %v1417_v53 = vpop.eup %1416 }
 0x21f   :  { %274 = vrot.lane.b32.xlu1 %v1417_v53, %s1601_s11 }
 0x291   :  { %v275_v55 = vpop.permute.xlu1 %274 }
 0x292   :  { %v277_v56 = vmul.f32 %v1415_v45, %v275_v55 }
 0x294   :  { %v1745_v57 = vsel %vm278_vm2, %v277_v56, 0.0 }
 0x295   :  { %v286_v58 = vpack.c.bf16 %v1745_v57, %v1745_v57 }
 0x297   :  { %294 = vrot.lane.b32.xlu0 %v286_v58, %s1610_s1 }
 0x309   :  { %v295_v59 = vpop.permute.xlu0 %294 }
 0x30a   :  { %1309 = vmatmul.mubr.msk.bf16.vlgmr.msra.gmra.mrb[8].mxu1 %vm104_vm0, %v295_v59 }
 0x30b   :  { %1324 = vmatprep.mubr.msk.bf16.mxu1 %vm1609_vm1, %v1608_v16  ;;  %1321 = vmatpush3.bf16.msra.mxu1 %v1398_v42 }
 0x30c   :  { %1322 = vmatprep.subr.bf16.mxu1 %v1608_v16 }
 0x30f   :  { %1323 = vmatpush3.bf16.msra.mxu1 %v1399_v43 }
 0x310   :  { %1336 = vmatprep.subr.bf16.mxu1 %v1608_v16 }
 0x3dd   :  { %v345_v60 = vpop.f32.mrb[8].mxu1 }
 0x3de   :  { %v346_v61 = vadd.f32 %v345_v60, %v155_v34  ;;  %v1310_v62 = vpop.f32.mrb[9].mxu1 }
 0x3df   :  { %v348_v63 = vpop.f32.mrb[10].mxu1 }
 0x3e0   :  { %1418 = vtanh.f32 %v346_v61  ;;  %v1311_v0 = vpop.f32.mrb[11].mxu1  ;;  %v1216_v2 = vmul.f32 -1.442695, %v346_v61 }
 0x3e2   :  { %1420 = vpow2.f32 %v1216_v2 }
 0x3ea   :  { %v1419_v1 = vpop.eup %1418 }
 0x3eb   :  { %360 = vrot.lane.b32.xlu1 %v1419_v1, %s1601_s11 }
 0x3ec   :  { %v1421_v3 = vpop.eup %1420 }
 0x3ed   :  { %v354_v4 = vadd.f32 1.0, %v1421_v3  ;;  %v1400_v3 = vld [vmem:[#allocation7] sm:$0xff]  }
 0x3ef   :  { %1422 = vrcp.f32 %v354_v4  ;;  %v1401_v4 = vld [vmem:[#allocation7 + $0x8] sm:$0xff]  }
 0x3f9   :  { %v1423_v5 = vpop.eup %1422 }
 0x3fa   :  { %v358_v9 = vmul.f32 %v1423_v5, %v280_v8 }
 0x45d   :  { %v361_v6 = vpop.permute.xlu1 %360 }
 0x45e   :  { %v363_v7 = vmul.f32 %v1423_v5, %v361_v6 }
 0x460   :  { %365 = vrot.lane.b32.xlu0 %v363_v7, %s1610_s1 }
 0x4d2   :  { %v366_v10 = vpop.permute.xlu0 %365 }
 0x4d3   :  { %v368_v11 = vadd.f32 %v366_v10, %v358_v9 }
 0x4d5   :  { %1424 = vtanh.f32 %v368_v11 }
 0x4df   :  { %v1425_v14 = vpop.eup %1424 }
 0x4e0   :  { %371 = vrot.lane.b32.xlu1 %v1425_v14, %s1601_s11 }
 0x552   :  { %v372_v15 = vpop.permute.xlu1 %371 }
 0x553   :  { %v1760_v17 = vmul.f32 %v1423_v5, %v372_v15 }
 0x555   :  { %v376_v18 = vsel %vm375_vm3, %v1760_v17, %v1745_v57 }
 0x556   :  { %v385_v19 = vpack.c.bf16 %v376_v18, %v376_v18 }
 0x558   :  { %393 = vrot.lane.b32.xlu0 %v385_v19, %s1610_s1 }
 0x5ca   :  { %v394_v20 = vpop.permute.xlu0 %393 }
 0x5cb   :  { %1317 = vmatmul.mubr.msk.bf16.vlgmr.msra.gmra.mrb[4].mxu0 %vm104_vm0, %v394_v20 }
 0x5cc   :  { %1332 = vmatprep.mubr.msk.bf16.mxu0 %vm1609_vm1, %v1608_v16  ;;  %1329 = vmatpush3.bf16.msra.mxu0 %v1400_v3 }
 0x5cd   :  { %1330 = vmatprep.subr.bf16.mxu0 %v1608_v16 }
 0x5d0   :  { %1331 = vmatpush3.bf16.msra.mxu0 %v1401_v4 }
 0x5d1   :  { %1344 = vmatprep.subr.bf16.mxu0 %v1608_v16 }
 0x69e   :  { %v444_v21 = vpop.f32.mrb[4].mxu0 }
 0x69f   :  { %v445_v23 = vadd.f32 %v444_v21, %v1725_v24  ;;  %v1318_v25 = vpop.f32.mrb[5].mxu0  ;;  %v377_v24 = vsel %vm375_vm3, %v368_v11, %v280_v8 }
 0x6a0   :  { %v447_v27 = vpop.f32.mrb[6].mxu0 }
 0x6a1   :  { %1426 = vtanh.f32 %v445_v23  ;;  %v1319_v28 = vpop.f32.mrb[7].mxu0  ;;  %v1220_v32 = vmul.f32 -1.442695, %v445_v23 }
 0x6a3   :  { %1428 = vpow2.f32 %v1220_v32 }
 0x6ab   :  { %v1427_v30 = vpop.eup %1426 }
 0x6ac   :  { %459 = vrot.lane.b32.xlu1 %v1427_v30, %s1601_s11 }
 0x6ad   :  { %v1429_v34 = vpop.eup %1428 }
 0x6ae   :  { %v453_v35 = vadd.f32 1.0, %v1429_v34  ;;  %v1402_v34 = vld [vmem:[#allocation7] sm:$0xff]  }
 0x6b0   :  { %1430 = vrcp.f32 %v453_v35  ;;  %v1403_v35 = vld [vmem:[#allocation7 + $0x8] sm:$0xff]  }
 0x6ba   :  { %v1431_v36 = vpop.eup %1430 }
 0x6bb   :  { %v457_v39 = vmul.f32 %v1431_v36, %v377_v24 }
 0x71e   :  { %v460_v37 = vpop.permute.xlu1 %459 }
 0x71f   :  { %v462_v38 = vmul.f32 %v1431_v36, %v460_v37 }
 0x721   :  { %464 = vrot.lane.b32.xlu0 %v462_v38, %s1610_s1 }
 0x793   :  { %v465_v40 = vpop.permute.xlu0 %464 }
 0x794   :  { %v467_v41 = vadd.f32 %v465_v40, %v457_v39 }
 0x796   :  { %1432 = vtanh.f32 %v467_v41 }
 0x7a0   :  { %v1433_v44 = vpop.eup %1432 }
 0x7a1   :  { %470 = vrot.lane.b32.xlu1 %v1433_v44, %s1601_s11 }
 0x813   :  { %v471_v45 = vpop.permute.xlu1 %470 }
 0x814   :  { %v1779_v46 = vmul.f32 %v1431_v36, %v471_v45 }
 0x816   :  { %v475_v47 = vsel %vm474_vm4, %v1779_v46, %v376_v18 }
 0x817   :  { %v484_v48 = vpack.c.bf16 %v475_v47, %v475_v47 }
 0x819   :  { %492 = vrot.lane.b32.xlu0 %v484_v48, %s1610_s1 }
 0x88b   :  { %v493_v49 = vpop.permute.xlu0 %492 }
 0x88c   :  { %1325 = vmatmul.mubr.msk.bf16.vlgmr.msra.gmra.mrb[12].mxu1 %vm104_vm0, %v493_v49 }
 0x88d   :  { %1340 = vmatprep.mubr.msk.bf16.mxu1 %vm1609_vm1, %v1608_v16  ;;  %1337 = vmatpush3.bf16.msra.mxu1 %v1402_v34 }
 0x88e   :  { %1338 = vmatprep.subr.bf16.mxu1 %v1608_v16 }
 0x891   :  { %1339 = vmatpush3.bf16.msra.mxu1 %v1403_v35 }
 0x892   :  { %1352 = vmatprep.subr.bf16.mxu1 %v1608_v16 }
 0x95f   :  { %v543_v50 = vpop.f32.mrb[12].mxu1 }
 0x960   :  { %v544_v51 = vadd.f32 %v543_v50, %v1731_v31  ;;  %v1326_v52 = vpop.f32.mrb[13].mxu1  ;;  %v476_v31 = vsel %vm474_vm4, %v467_v41, %v377_v24 }
 0x961   :  { %v546_v53 = vpop.f32.mrb[14].mxu1 }
 0x962   :  { %1434 = vtanh.f32 %v544_v51  ;;  %v1327_v55 = vpop.f32.mrb[15].mxu1  ;;  %v1224_v58 = vmul.f32 -1.442695, %v544_v51 }
 0x964   :  { %1436 = vpow2.f32 %v1224_v58 }
 0x96c   :  { %v1435_v56 = vpop.eup %1434 }
 0x96d   :  { %558 = vrot.lane.b32.xlu1 %v1435_v56, %s1601_s11 }
 0x96e   :  { %v1437_v59 = vpop.eup %1436 }
 0x96f   :  { %v552_v60 = vadd.f32 1.0, %v1437_v59  ;;  %v1404_v59 = vld [vmem:[#allocation7] sm:$0xff]  }
 0x971   :  { %1438 = vrcp.f32 %v552_v60  ;;  %v1405_v60 = vld [vmem:[#allocation7 + $0x8] sm:$0xff]  }
 0x97b   :  { %v1439_v61 = vpop.eup %1438 }
 0x97c   :  { %v556_v0 = vmul.f32 %v1439_v61, %v476_v31 }
 0x9df   :  { %v559_v62 = vpop.permute.xlu1 %558 }
 0x9e0   :  { %v561_v63 = vmul.f32 %v1439_v61, %v559_v62 }
 0x9e2   :  { %563 = vrot.lane.b32.xlu0 %v561_v63, %s1610_s1 }
 0xa54   :  { %v564_v1 = vpop.permute.xlu0 %563 }
 0xa55   :  { %v566_v2 = vadd.f32 %v564_v1, %v556_v0 }
 0xa57   :  { %1440 = vtanh.f32 %v566_v2 }
 0xa61   :  { %v1441_v5 = vpop.eup %1440 }
 0xa62   :  { %569 = vrot.lane.b32.xlu1 %v1441_v5, %s1601_s11 }
 0xad4   :  { %v570_v6 = vpop.permute.xlu1 %569 }
 0xad5   :  { %v1797_v7 = vmul.f32 %v1439_v61, %v570_v6 }
 0xad7   :  { %v574_v8 = vsel %vm573_vm5, %v1797_v7, %v475_v47 }
 0xad8   :  { %v583_v9 = vpack.c.bf16 %v574_v8, %v574_v8 }
 0xada   :  { %591 = vrot.lane.b32.xlu0 %v583_v9, %s1610_s1 }
 0xb4c   :  { %v592_v10 = vpop.permute.xlu0 %591 }
 0xb4d   :  { %1333 = vmatmul.mubr.msk.bf16.vlgmr.msra.gmra.mrb[8].mxu0 %vm104_vm0, %v592_v10 }
 0xb4e   :  { %1348 = vmatprep.mubr.msk.bf16.mxu0 %vm1609_vm1, %v1608_v16  ;;  %1345 = vmatpush3.bf16.msra.mxu0 %v1404_v59 }
 0xb4f   :  { %1346 = vmatprep.subr.bf16.mxu0 %v1608_v16 }
 0xb52   :  { %1347 = vmatpush3.bf16.msra.mxu0 %v1405_v60 }
 0xc20   :  { %v642_v11 = vpop.f32.mrb[8].mxu0 }
 0xc21   :  { %v643_v12 = vadd.f32 %v642_v11, %v1727_v26  ;;  %v1334_v13 = vpop.f32.mrb[9].mxu0  ;;  %v575_v26 = vsel %vm573_vm5, %v566_v2, %v476_v31 }
 0xc22   :  { %v645_v14 = vpop.f32.mrb[10].mxu0 }
 0xc23   :  { %1442 = vtanh.f32 %v643_v12  ;;  %v1335_v15 = vpop.f32.mrb[11].mxu0  ;;  %v1228_v19 = vmul.f32 -1.442695, %v643_v12 }
 0xc25   :  { %1444 = vpow2.f32 %v1228_v19 }
 0xc2d   :  { %v1443_v18 = vpop.eup %1442 }
 0xc2e   :  { %657 = vrot.lane.b32.xlu1 %v1443_v18, %s1601_s11 }
 0xc2f   :  { %v1445_v20 = vpop.eup %1444 }
 0xc30   :  { %v651_v21 = vadd.f32 1.0, %v1445_v20  ;;  %v1406_v20 = vld [vmem:[#allocation7] sm:$0xff]  }
 0xc32   :  { %1446 = vrcp.f32 %v651_v21  ;;  %v1407_v21 = vld [vmem:[#allocation7 + $0x8] sm:$0xff]  }
 0xc3c   :  { %v1447_v23 = vpop.eup %1446 }
 0xc3d   :  { %v655_v28 = vmul.f32 %v1447_v23, %v575_v26 }
 0xca0   :  { %v658_v25 = vpop.permute.xlu1 %657 }
 0xca1   :  { %v660_v27 = vmul.f32 %v1447_v23, %v658_v25 }
 0xca3   :  { %662 = vrot.lane.b32.xlu0 %v660_v27, %s1610_s1 }
 0xd15   :  { %v663_v30 = vpop.permute.xlu0 %662 }
 0xd16   :  { %v665_v32 = vadd.f32 %v663_v30, %v655_v28 }
 0xd18   :  { %1448 = vtanh.f32 %v665_v32 }
 0xd22   :  { %v1449_v36 = vpop.eup %1448 }
 0xd23   :  { %668 = vrot.lane.b32.xlu1 %v1449_v36, %s1601_s11 }
 0xd95   :  { %v669_v37 = vpop.permute.xlu1 %668 }
 0xd96   :  { %v1815_v38 = vmul.f32 %v1447_v23, %v669_v37 }
 0xd98   :  { %v673_v24 = vsel %vm672_vm6, %v1815_v38, %v574_v8 }
 0xd99   :  { %v682_v39 = vpack.c.bf16 %v673_v24, %v673_v24 }
 0xd9b   :  { %690 = vrot.lane.b32.xlu0 %v682_v39, %s1610_s1 }
 0xe0d   :  { %v691_v40 = vpop.permute.xlu0 %690 }
 0xe0e   :  { %1341 = vmatmul.mubr.msk.bf16.vlgmr.msra.gmra.mrb[16].mxu1 %vm104_vm0, %v691_v40 }
 0xe0f   :  { %1356 = vmatprep.mubr.msk.bf16.mxu1 %vm1609_vm1, %v1608_v16  ;;  %1353 = vmatpush3.bf16.msra.mxu1 %v1406_v20 }
 0xe10   :  { %1354 = vmatprep.subr.bf16.mxu1 %v1608_v16 }
 0xe13   :  { %1355 = vmatpush3.bf16.msra.mxu1 %v1407_v21 }
 0xee1   :  { %v741_v41 = vpop.f32.mrb[16].mxu1 }
 0xee2   :  { %v742_v42 = vadd.f32 %v741_v41, %v1733_v33  ;;  %v1342_v43 = vpop.f32.mrb[17].mxu1  ;;  %v674_v33 = vsel %vm672_vm6, %v665_v32, %v575_v26 }
 0xee3   :  { %v744_v44 = vpop.f32.mrb[18].mxu1 }
 0xee4   :  { %1450 = vtanh.f32 %v742_v42  ;;  %v1343_v45 = vpop.f32.mrb[19].mxu1  ;;  %v1232_v48 = vmul.f32 -1.442695, %v742_v42  ;;  %v675_v44 = vsel %vm672_vm6, %v1815_v38, 0.0  ;;  %v1408_v38 = vld [vmem:[#allocation9] sm:$0xff]  }
 0xee5   :  { %1360 = vmatprep.subr.bf16.mxu0 %v1408_v38 }
 0xee6   :  { %1452 = vpow2.f32 %v1232_v48 }
 0xeee   :  { %v1451_v47 = vpop.eup %1450 }
 0xeef   :  { %756 = vrot.lane.b32.xlu1 %v1451_v47, %s1601_s11 }
 0xef0   :  { %v1453_v49 = vpop.eup %1452 }
 0xef1   :  { %v750_v50 = vadd.f32 1.0, %v1453_v49 }
 0xef3   :  { %1454 = vrcp.f32 %v750_v50 }
 0xefd   :  { %v1455_v51 = vpop.eup %1454 }
 0xefe   :  { %v754_v55 = vmul.f32 %v1455_v51, %v674_v33 }
 0xf61   :  { %v757_v52 = vpop.permute.xlu1 %756 }
 0xf62   :  { %v759_v53 = vmul.f32 %v1455_v51, %v757_v52 }
 0xf64   :  { %761 = vrot.lane.b32.xlu0 %v759_v53, %s1610_s1  ;;  %v1409_v53 = vld [vmem:[#allocation9 + $0x8] sm:$0xff]  }
 0xfd6   :  { %v762_v56 = vpop.permute.xlu0 %761 }
 0xfd7   :  { %v764_v58 = vadd.f32 %v762_v56, %v754_v55  ;;  %v378_v55 = vsel %vm375_vm3, %v1760_v17, 0.0  ;;  %v576_v56 = vsel %vm573_vm5, %v1797_v7, 0.0 }
 0xfd9   :  { %1456 = vtanh.f32 %v764_v58 }
 0xfe3   :  { %v1457_v61 = vpop.eup %1456 }
 0xfe4   :  { %767 = vrot.lane.b32.xlu1 %v1457_v61, %s1601_s11 }
0x1056   :  { %v768_v62 = vpop.permute.xlu1 %767 }
0x1057   :  { %v1832_v63 = vmul.f32 %v1455_v51, %v768_v62 }
0x1059   :  { %v772_v31 = vsel %vm771_vm7, %v1832_v63, %v673_v24 }
0x105a   :  { %v781_v0 = vpack.c.bf16 %v772_v31, %v772_v31 }
0x105c   :  { %789 = vrot.lane.b32.xlu0 %v781_v0, %s1610_s1 }
0x10ce   :  { %v790_v1 = vpop.permute.xlu0 %789 }
0x10cf   :  { %1349 = vmatmul.mubr.msk.bf16.vlgmr.msra.gmra.mrb[12].mxu0 %vm104_vm0, %v790_v1 }
0x10d0   :  { %1361 = vmatpush3.bf16.msra.mxu0 %v1408_v38 }
0x10d1   :  { %1362 = vmatprep.subr.bf16.mxu0 %v1409_v53 }
0x10d4   :  { %1363 = vmatpush3.bf16.msra.mxu0 %v1409_v53 }
0x11a2   :  { %v840_v2 = vpop.f32.mrb[12].mxu0 }
0x11a3   :  { %v841_v3 = vadd.f32 %v840_v2, %v1723_v22  ;;  %v1350_v4 = vpop.f32.mrb[13].mxu0  ;;  %v773_v22 = vsel %vm771_vm7, %v764_v58, %v674_v33  ;;  %v774_v58 = vsel %vm771_vm7, %v1832_v63, 0.0 }
0x11a4   :  { %v843_v5 = vpop.f32.mrb[14].mxu0 }
0x11a5   :  { %1458 = vtanh.f32 %v841_v3  ;;  %v1351_v6 = vpop.f32.mrb[15].mxu0  ;;  %v1236_v9 = vmul.f32 -1.442695, %v841_v3 }
0x11a7   :  { %1460 = vpow2.f32 %v1236_v9 }
0x11af   :  { %v1459_v8 = vpop.eup %1458 }
0x11b0   :  { %855 = vrot.lane.b32.xlu1 %v1459_v8, %s1601_s11 }
0x11b1   :  { %v1461_v10 = vpop.eup %1460 }
0x11b2   :  { %v849_v11 = vadd.f32 1.0, %v1461_v10 }
0x11b4   :  { %1462 = vrcp.f32 %v849_v11  ;;  %v1241_v11 = vld [vmem:[%s1977_s6] ss:$0 sm:$0xff]  ;;  %s1611_s6 = smov [#allocation10]  }
0x11b5   :  { %s1190_s23 = sshll.u32 %s1611_s6, 4  ;;  %s1191_s23 = int_to_ptr.vmem [resolvable:$true] %s1190_s23 }
0x11b6   :  { %s1572_s24 = scalar_lea.vmem %s1191_s23, 1024  ;;  %p1577_p11 = scmp.lt.s32.totalorder %s1191_s23, %s1191_s23 }
0x11b7   :  { %p1573_p10 = scmp.ne.s32.totalorder %s1191_s23, %s1572_s24  ;;  %p1578_p12 = scmp.lt.s32.totalorder %s1572_s24, %s1572_s24 }
0x11b9   :  { %p1579_p13 = por %p1578_p12, %p1577_p11 }
0x11bb   :  { %p1580_p0 = pnand %p1579_p13, %p1573_p10 }
0x11be   :  { %v1463_v12 = vpop.eup %1462 }
0x11bf   :  { %v853_v15 = vmul.f32 %v1463_v12, %v773_v22 }
0x1222   :  { %v856_v13 = vpop.permute.xlu1 %855 }
0x1223   :  { %v858_v14 = vmul.f32 %v1463_v12, %v856_v13 }
0x1225   :  { %860 = vrot.lane.b32.xlu0 %v858_v14, %s1610_s1 }
0x1297   :  { %v861_v18 = vpop.permute.xlu0 %860 }
0x1298   :  { %v863_v19 = vadd.f32 %v861_v18, %v853_v15 }
0x129a   :  { %1464 = vtanh.f32 %v863_v19 }
0x12a4   :  { %v1465_v23 = vpop.eup %1464 }
0x12a5   :  { %866 = vrot.lane.b32.xlu1 %v1465_v23, %s1601_s11 }
0x1317   :  { %v867_v25 = vpop.permute.xlu1 %866 }
0x1318   :  { %v869_v27 = vmul.f32 %v1463_v12, %v867_v25 }
0x131a   :  { %v871_v26 = vsel %vm870_vm8, %v869_v27, %v772_v31  ;;  %v873_v45 = vsel %vm870_vm8, %v869_v27, 0.0 }
0x131b   :  { %v880_v28 = vpack.c.bf16 %v871_v26, %v871_v26 }
0x131d   :  { %888 = vrot.lane.b32.xlu0 %v880_v28, %s1610_s1 }
0x138f   :  { %v889_v30 = vpop.permute.xlu0 %888 }
0x1390   :  { %1357 = vmatmul.mubr.msk.bf16.vlgmr.msra.gmra.mrb[20].mxu1 %vm104_vm0, %v889_v30 }
0x1463   :  { %v939_v32 = vpop.f32.mrb[20].mxu1 }
0x1464   :  { %v940_v16 = vadd.f32 %v939_v32, %v1729_v29  ;;  %v1358_v34 = vpop.f32.mrb[21].mxu1  ;;  %v477_v29 = vsel %vm474_vm4, %v1779_v46, 0.0 }
0x1465   :  { %v942_v35 = vpop.f32.mrb[22].mxu1 }
0x1466   :  { %1466 = vtanh.f32 %v940_v16  ;;  %v1359_v36 = vpop.f32.mrb[23].mxu1  ;;  %v1240_v24 = vmul.f32 -1.442695, %v940_v16 }
0x1468   :  { %1468 = vpow2.f32 %v1240_v24 }
0x1470   :  { %v1467_v37 = vpop.eup %1466 }
0x1471   :  { %954 = vrot.lane.b32.xlu1 %v1467_v37, %s1601_s11 }
0x1472   :  { %v1469_v39 = vpop.eup %1468 }
0x1473   :  { %v948_v40 = vadd.f32 1.0, %v1469_v39 }
0x1475   :  { %1470 = vrcp.f32 %v948_v40 }
0x147f   :  { %v1471_v41 = vpop.eup %1470 }
0x14e3   :  { %v955_v42 = vpop.permute.xlu1 %954 }
0x14e4   :  { %v957_v43 = vmul.f32 %v1471_v41, %v955_v42 }
0x14e6   :  { %959 = vrot.lane.b32.xlu0 %v957_v43, %s1610_s1 }
0x14ea   :  { %282 = vrot.lane.b32.xlu0 %v1745_v57, %s1610_s1  ;;  %v872_v57 = vsel %vm870_vm8, %v863_v19, %v773_v22 }
0x14eb   :  { %v952_v47 = vmul.f32 %v1471_v41, %v872_v57 }
0x14ee   :  { %479 = vrot.lane.b32.xlu0 %v477_v29, %s1610_s1 }
0x14f2   :  { %677 = vrot.lane.b32.xlu0 %v675_v44, %s1610_s1 }
0x14f6   :  { %875 = vrot.lane.b32.xlu0 %v873_v45, %s1610_s1 }
0x1558   :  { %v960_v48 = vpop.permute.xlu0 %959 }
0x1559   :  { %v962_v49 = vadd.f32 %v960_v48, %v952_v47 }
0x155b   :  { %1472 = vtanh.f32 %v962_v49 }
0x155c   :  { %v283_v46 = vpop.permute.xlu0 %282 }
0x155d   :  { %285 = vst.msk [vmem:[#allocation3] sm:$0xff] %vm104_vm0, %v283_v46 }
0x1560   :  { %v480_v50 = vpop.permute.xlu0 %479 }
0x1561   :  { %483 = vst.msk [vmem:[#allocation3 + $0x10] sm:$0xff] %vm104_vm0, %v480_v50 }
0x1564   :  { %v678_v51 = vpop.permute.xlu0 %677  ;;  %v977_v31 = vld [vmem:[#allocation3] sm:$0xff] }
0x1565   :  { %v1473_v52 = vpop.eup %1472  ;;  %681 = vst.msk [vmem:[#allocation3 + $0x20] sm:$0xff] %vm104_vm0, %v678_v51 }
0x1566   :  { %965 = vrot.lane.b32.xlu1 %v1473_v52, %s1601_s11 }
0x1568   :  { %v876_v33 = vpop.permute.xlu0 %875  ;;  %v979_v1 = vld [vmem:[#allocation3 + $0x10] sm:$0xff] }
0x1569   :  { %879 = vst.msk [vmem:[#allocation3 + $0x30] sm:$0xff] %vm104_vm0, %v876_v33 }
0x156a   :  { %380 = vrot.lane.b32.xlu1 %v378_v55, %s1610_s1 }
0x156c   :  { %v981_v3 = vld [vmem:[#allocation3 + $0x20] sm:$0xff] }
0x156e   :  { %578 = vrot.lane.b32.xlu1 %v576_v56, %s1610_s1 }
0x1570   :  { %v983_v8 = vld [vmem:[#allocation3 + $0x30] sm:$0xff] }
0x1572   :  { %776 = vrot.lane.b32.xlu1 %v774_v58, %s1610_s1 }
0x15d8   :  { %v966_v59 = vpop.permute.xlu1 %965 }
0x15d9   :  { %v968_v60 = vmul.f32 %v1471_v41, %v966_v59 }
0x15db   :  { %v970_v61 = vsel %vm969_vm9, %v968_v60, 0.0 }
0x15dc   :  { %972 = vrot.lane.b32.xlu1 %v970_v61, %s1610_s1  ;;  %v381_v17 = vpop.permute.xlu1 %380 }
0x15dd   :  { %384 = vst.msk [vmem:[#allocation3 + $0x8] sm:$0xff] %vm104_vm0, %v381_v17 }
0x15e0   :  { %v579_v62 = vpop.permute.xlu1 %578 }
0x15e1   :  { %582 = vst.msk [vmem:[#allocation3 + $0x18] sm:$0xff] %vm104_vm0, %v579_v62 }
0x15e4   :  { %v777_v7 = vpop.permute.xlu1 %776  ;;  %v978_v0 = vld [vmem:[#allocation3 + $0x8] sm:$0xff] }
0x15e5   :  { %780 = vst.msk [vmem:[#allocation3 + $0x28] sm:$0xff] %vm104_vm0, %v777_v7  ;;  %v985_v63 = vpack.c.bf16 %v978_v0, %v977_v31 }
0x15e7   :  { %1364 = vmatprep.mubr.msk.bf16.mxu0 %vm104_vm0, %v985_v63 }
0x15e8   :  { %v980_v2 = vld [vmem:[#allocation3 + $0x18] sm:$0xff] }
0x15e9   :  { %v986_v54 = vpack.c.bf16 %v980_v2, %v979_v1 }
0x15eb   :  { %1365 = vmatmul.mubr.msk.bf16.vlgmr.msra.gmra.mrb[16].mxu0 %vm104_vm0, %v986_v54 }
0x15ec   :  { %v982_v4 = vld [vmem:[#allocation3 + $0x28] sm:$0xff] }
0x15ed   :  { %v987_v5 = vpack.c.bf16 %v982_v4, %v981_v3 }
0x15ef   :  { %1368 = vmatprep.mubr.msk.bf16.mxu0 %vm104_vm0, %v987_v5 }
0x164e   :  { %v973_v6 = vpop.permute.xlu1 %972 }
0x164f   :  { %976 = vst.msk [vmem:[#allocation3 + $0x38] sm:$0xff] %vm104_vm0, %v973_v6 }
0x1656   :  { %v984_v9 = vld [vmem:[#allocation3 + $0x38] sm:$0xff] }
0x1657   :  { %v988_v10 = vpack.c.bf16 %v984_v9, %v983_v8 }
0x1659   :  { %1369 = vmatmul.mubr.msk.bf16.gmra.mrb[20].mxu0 %vm104_vm0, %v988_v10 }
0x16be   :  { %v1366_v12 = vpop.f32.mrb[16].mxu0 }
0x16bf   :  { %v1058_v13 = vpop.f32.mrb[17].mxu0  ;;  %v1905_v19 = vadd.f32 %v1366_v12, %v1241_v11 }
0x16c0   :  { %v1900_v14 = vadd.f32 %v1241_v11, %v1058_v13  ;;  %v1367_v22 = vpop.f32.mrb[18].mxu0 }
0x16c1   :  { %v1061_v15 = vpop.f32.mrb[19].mxu0  ;;  %v1909_v20 = vadd.f32 %v1367_v22, %v1241_v11 }
0x16c2   :  { %v1902_v18 = vadd.f32 %v1241_v11, %v1061_v15  ;;  %1089 = vmax.xlane.f32.xlu0 %v1900_v14 }
0x16c4   :  { %1091 = vmax.xlane.f32.xlu1 %v1902_v18 }
0x16c6   :  { %1093 = vmax.xlane.f32.xlu0 %v1905_v19 }
0x16ca   :  { %1095 = vmax.xlane.f32.xlu0 %v1909_v20 }
0x172c   :  { %v1370_v21 = vpop.f32.mrb[20].mxu0 }
0x172d   :  { %v1074_v23 = vpop.f32.mrb[21].mxu0  ;;  %v1917_v30 = vadd.f32 %v1370_v21, %v1241_v11 }
0x172e   :  { %v1912_v25 = vadd.f32 %v1241_v11, %v1074_v23  ;;  %v1371_v27 = vpop.f32.mrb[22].mxu0 }
0x172f   :  { %v1077_v26 = vpop.f32.mrb[23].mxu0  ;;  %v1920_v32 = vadd.f32 %v1371_v27, %v1241_v11 }
0x1730   :  { %v1914_v28 = vadd.f32 %v1241_v11, %v1077_v26  ;;  %1097 = vmax.xlane.f32.xlu1 %v1912_v25 }
0x1732   :  { %1099 = vmax.xlane.f32.xlu0 %v1914_v28 }
0x1734   :  { %1101 = vmax.xlane.f32.xlu1 %v1917_v30 }
0x1736   :  { %1103 = vmax.xlane.f32.xlu0 %v1920_v32 }
0x174f   :  { %v1090_v16 = vpop.xlane.xlu0 %1089 }
0x1750   :  { %v1105_v34 = vsub.f32 %v1900_v14, %v1090_v16 }
0x1751   :  { %v1092_v35 = vpop.xlane.xlu1 %1091 }
0x1752   :  { %v1113_v36 = vmul.f32 1.442695, %v1105_v34  ;;  %v1106_v37 = vsub.f32 %v1902_v18, %v1092_v35 }
0x1753   :  { %v1094_v24 = vpop.xlane.xlu0 %1093 }
0x1754   :  { %1474 = vpow2.f32 %v1113_v36  ;;  %v1115_v39 = vmul.f32 1.442695, %v1106_v37  ;;  %v1107_v40 = vsub.f32 %v1905_v19, %v1094_v24 }
0x1756   :  { %1476 = vpow2.f32 %v1115_v39  ;;  %v1117_v41 = vmul.f32 1.442695, %v1107_v40 }
0x1757   :  { %v1096_v42 = vpop.xlane.xlu0 %1095 }
0x1758   :  { %1478 = vpow2.f32 %v1117_v41  ;;  %v1108_v43 = vsub.f32 %v1909_v20, %v1096_v42 }
0x175a   :  { %v1119_v29 = vmul.f32 1.442695, %v1108_v43 }
0x175c   :  { %1480 = vpow2.f32 %v1119_v29 }
0x175e   :  { %v1475_v44 = vpop.eup %1474 }
0x175f   :  { %1129 = vadd.xlane.f32.xlu1 %v1475_v44 }
0x1760   :  { %v1477_v45 = vpop.eup %1476 }
0x1761   :  { %1131 = vadd.xlane.f32.xlu0 %v1477_v45 }
0x1762   :  { %v1479_v57 = vpop.eup %1478 }
0x1763   :  { %1133 = vadd.xlane.f32.xlu1 %v1479_v57 }
0x1766   :  { %v1481_v47 = vpop.eup %1480 }
0x1767   :  { %1135 = vadd.xlane.f32.xlu0 %v1481_v47 }
0x17bd   :  { %v1928_v48 = vpop.xlane.xlu1 %1097 }
0x17be   :  { %v1109_v49 = vsub.f32 %v1912_v25, %v1928_v48 }
0x17bf   :  { %v1932_v46 = vpop.xlane.xlu0 %1099 }
0x17c0   :  { %v1121_v50 = vmul.f32 1.442695, %v1109_v49  ;;  %v1110_v38 = vsub.f32 %v1914_v28, %v1932_v46 }
0x17c1   :  { %v1936_v51 = vpop.xlane.xlu1 %1101 }
0x17c2   :  { %1482 = vpow2.f32 %v1121_v50  ;;  %v1123_v52 = vmul.f32 1.442695, %v1110_v38  ;;  %v1111_v53 = vsub.f32 %v1917_v30, %v1936_v51 }
0x17c3   :  { %v1940_v33 = vpop.xlane.xlu0 %1103 }
0x17c4   :  { %1484 = vpow2.f32 %v1123_v52  ;;  %v1125_v55 = vmul.f32 1.442695, %v1111_v53  ;;  %v1112_v56 = vsub.f32 %v1920_v32, %v1940_v33 }
0x17c6   :  { %1486 = vpow2.f32 %v1125_v55  ;;  %v1127_v58 = vmul.f32 1.442695, %v1112_v56 }
0x17c8   :  { %1488 = vpow2.f32 %v1127_v58 }
0x17cc   :  { %v1483_v59 = vpop.eup %1482 }
0x17cd   :  { %1137 = vadd.xlane.f32.xlu1 %v1483_v59 }
0x17ce   :  { %v1485_v60 = vpop.eup %1484 }
0x17cf   :  { %1139 = vadd.xlane.f32.xlu0 %v1485_v60 }
0x17d0   :  { %v1487_v61 = vpop.eup %1486 }
0x17d1   :  { %1141 = vadd.xlane.f32.xlu1 %v1487_v61 }
0x17d2   :  { %v1489_v17 = vpop.eup %1488 }
0x17d3   :  { %1143 = vadd.xlane.f32.xlu0 %v1489_v17 }
0x17ec   :  { %v1130_v62 = vpop.xlane.xlu1 %1129 }
0x17ed   :  { %1490 = vlog2.f32 %v1130_v62 }
0x17ee   :  { %v1132_v7 = vpop.xlane.xlu0 %1131 }
0x17ef   :  { %1492 = vlog2.f32 %v1132_v7 }
0x17f0   :  { %v1134_v31 = vpop.xlane.xlu1 %1133 }
0x17f1   :  { %1494 = vlog2.f32 %v1134_v31 }
0x17f4   :  { %v1136_v0 = vpop.xlane.xlu0 %1135 }
0x17f5   :  { %1496 = vlog2.f32 %v1136_v0 }
0x17f7   :  { %v1491_v63 = vpop.eup %1490 }
0x17f8   :  { %v1146_v1 = vmul.f32 0.6931472, %v1491_v63 }
0x17f9   :  { %v1493_v2 = vpop.eup %1492 }
0x17fa   :  { %v1161_v54 = vadd.f32 %v1146_v1, %v1090_v16  ;;  %v1148_v3 = vmul.f32 0.6931472, %v1493_v2 }
0x17fb   :  { %v1495_v4 = vpop.eup %1494 }
0x17fc   :  { %v1169_v5 = vsub.f32 %v1900_v14, %v1161_v54  ;;  %v1162_v6 = vadd.f32 %v1148_v3, %v1092_v35  ;;  %v1150_v8 = vmul.f32 0.6931472, %v1495_v4 }
0x17fe   :  { %1177 = vst [vmem:[#allocation10] sm:$0xff] %v1169_v5  ;;  %v1170_v9 = vsub.f32 %v1902_v18, %v1162_v6  ;;  %v1163_v10 = vadd.f32 %v1150_v8, %v1094_v24 }
0x17ff   :  { %v1497_v11 = vpop.eup %1496 }
0x1800   :  { %1178 = vst [vmem:[#allocation10 + $0x8] sm:$0xff] %v1170_v9  ;;  %v1171_v12 = vsub.f32 %v1905_v19, %v1163_v10  ;;  %v1152_v13 = vmul.f32 0.6931472, %v1497_v11 }
0x1802   :  { %1179 = vst [vmem:[#allocation10 + $0x10] sm:$0xff] %v1171_v12  ;;  %v1164_v22 = vadd.f32 %v1152_v13, %v1096_v42 }
0x1804   :  { %v1172_v15 = vsub.f32 %v1909_v20, %v1164_v22 }
0x1806   :  { %1180 = vst [vmem:[#allocation10 + $0x18] sm:$0xff] %v1172_v15 }
0x185a   :  { %v1138_v21 = vpop.xlane.xlu1 %1137 }
0x185b   :  { %1498 = vlog2.f32 %v1138_v21 }
0x185c   :  { %v1140_v23 = vpop.xlane.xlu0 %1139 }
0x185d   :  { %1500 = vlog2.f32 %v1140_v23 }
0x185e   :  { %v1142_v14 = vpop.xlane.xlu1 %1141 }
0x185f   :  { %1502 = vlog2.f32 %v1142_v14 }
0x1860   :  { %v1144_v27 = vpop.xlane.xlu0 %1143 }
0x1861   :  { %1504 = vlog2.f32 %v1144_v27 }
0x1865   :  { %v1499_v18 = vpop.eup %1498 }
0x1866   :  { %v1154_v26 = vmul.f32 0.6931472, %v1499_v18 }
0x1867   :  { %v1501_v16 = vpop.eup %1500 }
0x1868   :  { %v1165_v34 = vadd.f32 %v1154_v26, %v1928_v48  ;;  %v1156_v19 = vmul.f32 0.6931472, %v1501_v16 }
0x1869   :  { %v1503_v35 = vpop.eup %1502 }
0x186a   :  { %v1173_v36 = vsub.f32 %v1912_v25, %v1165_v34  ;;  %v1166_v20 = vadd.f32 %v1156_v19, %v1932_v46  ;;  %v1158_v37 = vmul.f32 0.6931472, %v1503_v35 }
0x186b   :  { %v1505_v24 = vpop.eup %1504 }
0x186c   :  { %1181 = vst [vmem:[#allocation10 + $0x20] sm:$0xff] %v1173_v36  ;;  %v1174_v39 = vsub.f32 %v1914_v28, %v1166_v20  ;;  %v1167_v40 = vadd.f32 %v1158_v37, %v1936_v51  ;;  %v1160_v41 = vmul.f32 0.6931472, %v1505_v24 }
0x186e   :  { %1182 = vst [vmem:[#allocation10 + $0x28] sm:$0xff] %v1174_v39  ;;  %v1175_v42 = vsub.f32 %v1917_v30, %v1167_v40  ;;  %v1168_v43 = vadd.f32 %v1160_v41, %v1940_v33 }
0x1870   :  { %1183 = vst [vmem:[#allocation10 + $0x30] sm:$0xff] %v1175_v42  ;;  %v1176_v25 = vsub.f32 %v1920_v32, %v1168_v43 }
0x1872   :  { %1184 = vst [vmem:[#allocation10 + $0x38] sm:$0xff] %v1176_v25 }
0x1873   :  { %1583 = shalt.err (!%p1580_p0)
}
0x1874   :  { %s1584_s28 = scalar_lea.hbm %s1978_s7, 1024 }
0x1875   :  { %p1585_p1 = scmp.ne.s32.totalorder %s1978_s7, %s1584_s28  ;;  %p1588_p2 = scmp.lt.u32.totalorder %s1584_s28, %s1978_s7 }
0x1877   :  { %p1590_p3 = pnand %p1588_p2, %p1585_p1 }
0x1879   :  { %1593 = shalt.err (!%p1590_p3)
}
0x187a   :  { %1196 = dma.vmem_to_hbm [thread:$0]  %s1191_s23, 1024, %s1978_s7, [#allocation6], %s1604_s3, %s1604_s3, %s1605_s25  }
0x187b   :  { %1598 = dma.done.wait [#allocation6], 1024  }
0x187c   :  { %1599 = vsyncadd [#allocation6], 4294966272 }
0x187d   :  { %1200 = vsyncpa [#allocation5], 1 }
0x187e   :  { %1201 = vsyncpa [#allocation8], 1 }
0x187f   :  { %1202 = vsyncpa [#allocation6], 1 }

</bundles_post_ra>
